<compile_context>
chip_gen: v7x
topology: tpu7x:2x2x1
jax: 0.10.0
libtpu: 0.0.40
codegen_flags: <defaults>
</compile_context>

<pallas_src>
import functools

import numpy as np
import jax
import jax.numpy as jnp
from jax.experimental import pallas as pl
from jax.experimental.pallas import tpu as pltpu


# ----------------------------------------------------------------------------
# Kernel: one block of `bb` batch elements of the bmm-attention per grid step.
# ----------------------------------------------------------------------------
def _sdpa_kernel(*refs, inv_temperature, has_mask):
    if has_mask:
        q_ref, k_ref, v_ref, m_ref, out_ref, attn_ref = refs
    else:
        q_ref, k_ref, v_ref, out_ref, attn_ref = refs
        m_ref = None

    q = q_ref[...]          # [bb, Lq, Dk]
    k = k_ref[...]          # [bb, Lk, Dk]
    v = v_ref[...]          # [bb, Lk, Dv]

    # Batched Q @ K^T without an explicit transpose: contract last axes,
    # batch over axis 0.  Accumulate in f32 on the MXU.
    scores = jax.lax.dot_general(
        q, k,
        dimension_numbers=(((2,), (2,)), ((0,), (0,))),
        preferred_element_type=jnp.float32,
    ) * inv_temperature      # [bb, Lq, Lk]

    if m_ref is not None:
        # Finite large-negative fill (PyTorch uses -inf; -1e30 gives identical
        # softmax for any row with at least one unmasked key and avoids NaN
        # for fully-masked rows).
        scores = jnp.where(m_ref[...] > 0.0, jnp.float32(-1e30), scores)

    # Numerically stable softmax over the key axis (dim=2).
    scores = scores - jnp.max(scores, axis=-1, keepdims=True)
    p = jnp.exp(scores)
    p = p * pl.reciprocal(jnp.sum(p, axis=-1, keepdims=True), approx=True)

    # Dropout runs in eval mode -> identity.
    attn_ref[...] = p.astype(attn_ref.dtype)

    # Batched attn @ V.
    out = jax.lax.dot_general(
        p.astype(v.dtype), v,
        dimension_numbers=(((2,), (1,)), ((0,), (0,))),
        preferred_element_type=jnp.float32,
    )                        # [bb, Lq, Dv]
    out_ref[...] = out.astype(out_ref.dtype)


def _pick_block_b(B, Lq, Lk, Dk, Dv, itemsize, vmem_budget=8 * 1024 * 1024):
    """Largest divisor of B that fits the VMEM budget; prefer grid >= 2."""
    per_b = (Lq * Dk + Lk * Dk + Lk * Dv + Lq * Dv + 2 * Lq * Lk) * itemsize
    cap = max(1, vmem_budget // max(per_b, 1))
    divs = [d for d in range(1, B + 1) if B % d == 0 and d <= cap]
    bb = max(divs) if divs else 1
    if bb == B and B > 1:
        halves = [d for d in divs if d <= B // 2]
        if halves:
            bb = max(halves)      # leave >=2 grid steps for multi-TC sharding
    return bb


# ----------------------------------------------------------------------------
# Wrapper
# ----------------------------------------------------------------------------
def scaled_dot_product_attention(q, k, v, mask=None, *, temperature, block_b=None):
    """q: [B, Lq, Dk], k: [B, Lk, Dk], v: [B, Lk, Dv], mask broadcastable to
    [B, Lq, Lk] (nonzero / True = masked).  Returns (output, attn)."""
    B, Lq, Dk = q.shape
    Bk, Lk, Dk2 = k.shape
    Bv, Lv, Dv = v.shape
    assert B == Bk == Bv and Dk == Dk2 and Lk == Lv

    has_mask = mask is not None
    if has_mask:
        # Lane-major key axis; float so the kernel needs no bool handling.
        mask_f = jnp.broadcast_to(mask, (B, Lq, Lk)).astype(jnp.float32)

    if block_b is None:
        block_b = _pick_block_b(B, Lq, Lk, Dk, Dv, jnp.dtype(q.dtype).itemsize)
    assert B % block_b == 0
    grid = (B // block_b,)

    kernel = functools.partial(
        _sdpa_kernel,
        inv_temperature=float(1.0 / temperature),
        has_mask=has_mask,
    )

    in_specs = [
        pl.BlockSpec((block_b, Lq, Dk), lambda b: (b, 0, 0)),   # q
        pl.BlockSpec((block_b, Lk, Dk), lambda b: (b, 0, 0)),   # k
        pl.BlockSpec((block_b, Lk, Dv), lambda b: (b, 0, 0)),   # v
    ]
    operands = [q, k, v]
    if has_mask:
        in_specs.append(pl.BlockSpec((block_b, Lq, Lk), lambda b: (b, 0, 0)))
        operands.append(mask_f)

    out_specs = [
        pl.BlockSpec((block_b, Lq, Dv), lambda b: (b, 0, 0)),   # output
        pl.BlockSpec((block_b, Lq, Lk), lambda b: (b, 0, 0)),   # attn
    ]
    out_shape = (
        jax.ShapeDtypeStruct((B, Lq, Dv), q.dtype),
        jax.ShapeDtypeStruct((B, Lq, Lk), q.dtype),
    )

    out, attn = pl.pallas_call(
        kernel,
        out_shape=out_shape,
        grid_spec=pltpu.PrefetchScalarGridSpec(
            num_scalar_prefetch=0,
            grid=grid,
            in_specs=in_specs,
            out_specs=out_specs,
        ),
        compiler_params=pltpu.CompilerParams(
            dimension_semantics=("parallel",),
        ),
    )(*operands)
    return out, attn


# ----------------------------------------------------------------------------
# Pure-JAX reference (mirrors the PyTorch forward, eval-mode dropout)
# ----------------------------------------------------------------------------
def sdpa_reference(q, k, v, mask=None, *, temperature):
    attn = jnp.einsum("bqd,bkd->bqk", q, k) / temperature
    if mask is not None:
        attn = jnp.where(mask > 0, -jnp.inf, attn)
    attn = jax.nn.softmax(attn, axis=-1)
    out = jnp.einsum("bqk,bkd->bqd", attn, v)
    return out, attn


if __name__ == "__main__":
    # Small but lane-aligned shapes: B = n_head * batch = 4, Lq = Lk = 128,
    # d_k = d_v = 128 (so every store is 128-lane dense).
    B, Lq, Lk, Dk, Dv = 4, 128, 128, 128, 128
    temperature = float(np.sqrt(Dk))

    key = jax.random.PRNGKey(0)
    kq, kk, kv = jax.random.split(key, 3)
    q = jax.random.normal(kq, (B, Lq, Dk), jnp.float32)
    k = jax.random.normal(kk, (B, Lk, Dk), jnp.float32)
    v = jax.random.normal(kv, (B, Lk, Dv), jnp.float32)

    # Key-padding-style mask: last 32 keys of batch element 1 are masked;
    # broadcast over the query axis like the transformer's attn mask.
    key_pad = jnp.zeros((B, 1, Lk), jnp.float32).at[1, 0, -32:].set(1.0)
    mask = jnp.broadcast_to(key_pad, (B, Lq, Lk))

    out, attn = scaled_dot_product_attention(q, k, v, mask, temperature=temperature)
    out = jax.block_until_ready(out)
    attn = jax.block_until_ready(attn)

    assert out.shape == (B, Lq, Dv) and attn.shape == (B, Lq, Lk)
    assert bool(jnp.all(jnp.isfinite(out))) and bool(jnp.all(jnp.isfinite(attn)))

    ref_out, ref_attn = sdpa_reference(q, k, v, mask, temperature=temperature)
    assert bool(jnp.allclose(out, ref_out, atol=1e-2, rtol=1e-2))
    assert bool(jnp.allclose(attn, ref_attn, atol=1e-2, rtol=1e-2))
    # Masked keys must receive (near) zero attention weight.
    assert float(jnp.max(attn[1, :, -32:])) < 1e-6

    print("KERNEL_OK")
</pallas_src>

<mosaic_0001>
module attributes {stable_mosaic.version = 11 : i64} {
  func.func @_sdpa_kernel(%arg0: i32, %arg1: memref<2x128x128xf32, #tpu.memory_space<vmem>>, %arg2: memref<2x128x128xf32, #tpu.memory_space<vmem>>, %arg3: memref<2x128x128xf32, #tpu.memory_space<vmem>>, %arg4: memref<2x128x128xf32, #tpu.memory_space<vmem>>, %arg5: memref<2x128x128xf32, #tpu.memory_space<vmem>>, %arg6: memref<2x128x128xf32, #tpu.memory_space<vmem>>) attributes {dimension_semantics = [#tpu.dimension_semantics<parallel>], iteration_bounds = array<i64: 2>, scalar_prefetch = 0 : i64, scratch_operands = 0 : i64, tpu.core_type = #tpu.core_type<tc>, window_params = [{transform_indices = @transform_0, window_bounds = array<i64: 2, 128, 128>}, {transform_indices = @transform_1, window_bounds = array<i64: 2, 128, 128>}, {transform_indices = @transform_2, window_bounds = array<i64: 2, 128, 128>}, {transform_indices = @transform_3, window_bounds = array<i64: 2, 128, 128>}, {transform_indices = @transform_4, window_bounds = array<i64: 2, 128, 128>}, {transform_indices = @transform_5, window_bounds = array<i64: 2, 128, 128>}]} {
    %c0 = arith.constant 0 : index
    %c0_0 = arith.constant 0 : index
    %c0_1 = arith.constant 0 : index
    %0 = vector.load %arg1[%c0, %c0_0, %c0_1] : memref<2x128x128xf32, #tpu.memory_space<vmem>>, vector<2x128x128xf32>
    %c0_2 = arith.constant 0 : index
    %c0_3 = arith.constant 0 : index
    %c0_4 = arith.constant 0 : index
    %1 = vector.load %arg2[%c0_2, %c0_3, %c0_4] : memref<2x128x128xf32, #tpu.memory_space<vmem>>, vector<2x128x128xf32>
    %c0_5 = arith.constant 0 : index
    %c0_6 = arith.constant 0 : index
    %c0_7 = arith.constant 0 : index
    %2 = vector.load %arg3[%c0_5, %c0_6, %c0_7] : memref<2x128x128xf32, #tpu.memory_space<vmem>>, vector<2x128x128xf32>
    %cst = arith.constant dense<0.000000e+00> : vector<2x128x128xf32>
    %3 = tpu.matmul %0, %1, %cst {dimension_numbers = #tpu.dot_dimension_numbers<[2], [2], [1], [1], [0, 0, 0, 1, 1, 1], [0], [0]>} : vector<2x128x128xf32>, vector<2x128x128xf32>, vector<2x128x128xf32> -> vector<2x128x128xf32>
    %cst_8 = arith.constant 0.0883883461 : f32
    %4 = vector.broadcast %cst_8 : f32 to vector<2x128x128xf32>
    %5 = arith.mulf %3, %4 : vector<2x128x128xf32>
    %c0_9 = arith.constant 0 : index
    %c0_10 = arith.constant 0 : index
    %c0_11 = arith.constant 0 : index
    %6 = vector.load %arg4[%c0_9, %c0_10, %c0_11] : memref<2x128x128xf32, #tpu.memory_space<vmem>>, vector<2x128x128xf32>
    %cst_12 = arith.constant 0.000000e+00 : f32
    %7 = vector.broadcast %cst_12 : f32 to vector<2x128x128xf32>
    %8 = arith.cmpf ogt, %6, %7 : vector<2x128x128xf32>
    %cst_13 = arith.constant -1.000000e+30 : f32
    %9 = vector.broadcast %cst_13 : f32 to vector<2x128x128xf32>
    %10 = arith.select %8, %9, %5 : vector<2x128x128xi1>, vector<2x128x128xf32>
    %cst_14 = arith.constant dense<0xFF800000> : vector<2x128xf32>
    %11 = vector.multi_reduction <maximumf>, %10, %cst_14 [2] : vector<2x128x128xf32> to vector<2x128xf32>
    %12 = vector.shape_cast %11 : vector<2x128xf32> to vector<2x128x1xf32>
    %13 = vector.broadcast %12 : vector<2x128x1xf32> to vector<2x128x128xf32>
    %14 = arith.subf %10, %13 : vector<2x128x128xf32>
    %15 = math.exp %14 : vector<2x128x128xf32>
    %cst_15 = arith.constant dense<0.000000e+00> : vector<2x128xf32>
    %16 = vector.multi_reduction <add>, %15, %cst_15 [2] : vector<2x128x128xf32> to vector<2x128xf32>
    %17 = vector.shape_cast %16 : vector<2x128xf32> to vector<2x128x1xf32>
    %18 = tpu.reciprocal %17 {approx = true} : vector<2x128x1xf32> -> vector<2x128x1xf32>
    %19 = vector.broadcast %18 : vector<2x128x1xf32> to vector<2x128x128xf32>
    %20 = arith.mulf %15, %19 : vector<2x128x128xf32>
    %c0_16 = arith.constant 0 : index
    %c0_17 = arith.constant 0 : index
    %c0_18 = arith.constant 0 : index
    %21 = vector.load %arg6[%c0_16, %c0_17, %c0_18] : memref<2x128x128xf32, #tpu.memory_space<vmem>>, vector<2x128x128xf32>
    tpu.vector_store %arg6[%c0_16, %c0_17, %c0_18], %20 {strides = array<i32>} : memref<2x128x128xf32, #tpu.memory_space<vmem>>, vector<2x128x128xf32>,
    %cst_19 = arith.constant dense<0.000000e+00> : vector<2x128x128xf32>
    %22 = tpu.matmul %20, %2, %cst_19 {dimension_numbers = #tpu.dot_dimension_numbers<[2], [1], [1], [2], [0, 0, 0, 1, 1, 2], [0], [0]>} : vector<2x128x128xf32>, vector<2x128x128xf32>, vector<2x128x128xf32> -> vector<2x128x128xf32>
    %c0_20 = arith.constant 0 : index
    %c0_21 = arith.constant 0 : index
    %c0_22 = arith.constant 0 : index
    %23 = vector.load %arg5[%c0_20, %c0_21, %c0_22] : memref<2x128x128xf32, #tpu.memory_space<vmem>>, vector<2x128x128xf32>
    tpu.vector_store %arg5[%c0_20, %c0_21, %c0_22], %22 {strides = array<i32>} : memref<2x128x128xf32, #tpu.memory_space<vmem>>, vector<2x128x128xf32>,
    return
  }
  func.func @transform_0(%arg0: i32) -> (i32, i32, i32) {
    %c0_i32 = arith.constant 0 : i32
    %c0_i32_0 = arith.constant 0 : i32
    %c0_i32_1 = arith.constant 0 : i32
    return %arg0, %c0_i32, %c0_i32_0 : i32, i32, i32
  }
  func.func @transform_1(%arg0: i32) -> (i32, i32, i32) {
    %c0_i32 = arith.constant 0 : i32
    %c0_i32_0 = arith.constant 0 : i32
    %c0_i32_1 = arith.constant 0 : i32
    return %arg0, %c0_i32, %c0_i32_0 : i32, i32, i32
  }
  func.func @transform_2(%arg0: i32) -> (i32, i32, i32) {
    %c0_i32 = arith.constant 0 : i32
    %c0_i32_0 = arith.constant 0 : i32
    %c0_i32_1 = arith.constant 0 : i32
    return %arg0, %c0_i32, %c0_i32_0 : i32, i32, i32
  }
  func.func @transform_3(%arg0: i32) -> (i32, i32, i32) {
    %c0_i32 = arith.constant 0 : i32
    %c0_i32_0 = arith.constant 0 : i32
    %c0_i32_1 = arith.constant 0 : i32
    return %arg0, %c0_i32, %c0_i32_0 : i32, i32, i32
  }
  func.func @transform_4(%arg0: i32) -> (i32, i32, i32) {
    %c0_i32 = arith.constant 0 : i32
    %c0_i32_0 = arith.constant 0 : i32
    %c0_i32_1 = arith.constant 0 : i32
    return %arg0, %c0_i32, %c0_i32_0 : i32, i32, i32
  }
  func.func @transform_5(%arg0: i32) -> (i32, i32, i32) {
    %c0_i32 = arith.constant 0 : i32
    %c0_i32_0 = arith.constant 0 : i32
    %c0_i32_1 = arith.constant 0 : i32
    return %arg0, %c0_i32, %c0_i32_0 : i32, i32, i32
  }
}

</mosaic_0001>

<bundles_post_ra>
// kernel: tpu_custom_call.1
= control target key start
LH: loop header
LB: loop body
LE: loop exit
PB: predicated region body
PF: predicated region fallthrough
CT: control target
= control target key end

     0   :  { %s3557_s0 = inlined_call_operand.hbm [shape: f32[4,128,128], index: 0, kind: input, shape index: {}]   ;;  %s3558_s1 = inlined_call_operand.hbm [shape: f32[4,128,128], index: 1, kind: input, shape index: {}]   ;;  %s3559_s2 = inlined_call_operand.hbm [shape: f32[4,128,128], index: 2, kind: input, shape index: {}]   ;;  %s3560_s3 = inlined_call_operand.hbm [shape: f32[4,128,128], index: 3, kind: input, shape index: {}]   ;;  %s3561_s4 = inlined_call_operand.hbm [shape: f32[4,128,128], index: 4, kind: output, shape index: {0}]   ;;  %s3562_s5 = inlined_call_operand.hbm [shape: f32[4,128,128], index: 5, kind: output, shape index: {1}]  }
   0x1   :  { %3570 = sst [smem:[#allocation20_spill]] %s3557_s0 }
   0x2   :  { %3571 = sst [smem:[#allocation21_spill]] %s3558_s1 }
   0x3   :  { %11 = vsyncpa [#allocation3], 0 }
   0x4   :  { %13 = vsyncpa [#allocation3 + $0x1], 0 }
   0x5   :  { %14 = vsyncpa [#allocation6], 0 }
   0x6   :  { %16 = vsyncpa [#allocation6 + $0x1], 0 }
   0x7   :  { %17 = vsyncpa [#allocation9], 0 }
   0x8   :  { %19 = vsyncpa [#allocation9 + $0x1], 0 }
   0x9   :  { %20 = vsyncpa [#allocation4], 0 }
   0xa   :  { %22 = vsyncpa [#allocation4 + $0x1], 0 }
   0xb   :  { %23 = vsyncpa [#allocation12], 0 }
   0xc   :  { %25 = vsyncpa [#allocation12 + $0x1], 0  ;;  %s2739_s18 = smov 0   ;;  %s2741_s19 = smov 0  }
   0xd   :  { %s2743_s20 = smov 0   ;;  %s2745_s21 = smov 0  }
   0xe LB: > { %3572 = sst [smem:[#allocation18_spill]] %s2693_s20  ;;  %s2760_s22 = sadd.s32 4294967295, %s2697_s21   ;;  %s2697_s21 = sphi %s2745_s21, %s3594_s21   ;;  %s2693_s20 = sphi %s2743_s20, %s3591_s20   ;;  %s2689_s19 = sphi %s2741_s19, %s3593_s19   ;;  %s2685_s18 = sphi %s2739_s18, %s3592_s18  }
   0xf   : > { %s1745_s23 = sadd.s32 4294967294, %s2697_s21   ;;  %s2764_s24 = sadd.s32 1, %s2697_s21  }
  0x10   : > { %s38_s25 = sadd.s32 1, %s2693_s20  ;;  %s35_s26 = ssub.s32 %s2697_s21, %s2764_s24 }
  0x11   : > { %p45_p0 = scmp.ne.s32.totalorder %s2693_s20, %s2689_s19  ;;  %p36_p1 = scmp.eq.s32.totalorder %s35_s26, 0 }
  0x12   : > { %p46_p2 = scmp.eq.s32.totalorder %s2697_s21, 0  ;;  %p51_p3 = scmp.ne.s32.totalorder %s2689_s19, %s2685_s18 }
  0x13   : > { %p52_p4 = scmp.eq.s32.totalorder %s2760_s22, 0  ;;  %p153_p7 = scmp.eq.s32.totalorder %s2760_s22, 1 }
  0x14   : > { %s2776_s27 = scalar_select %p36_p1, %s2693_s20, %s38_s25  }
  0x15   : > { %p47_p5 = por %p46_p2, %p45_p0  ;;  %p2778_p6 = por %p52_p4, %p51_p3 }
  0x16   : > { %3573 = sst [smem:[#allocation19_spill]] %s2776_s27  ;;  %p159_p8 = scmp.eq.s32.totalorder %s1745_s23, 1 }
  0x17   : > { %s3574_s28 = scalar_select %p2778_p6, 1, 0 }
  0x18   : > { %p2305_p10 = scmp.lt.s32.totalorder %s2697_s21, 2  ;;  %p2785_p11 = por %p153_p7, %p45_p0 }
  0x19   : > { %p2789_p12 = por %p159_p8, %p51_p3  ;;  %s2794_s6 = sand.u32 1, %s2693_s20  }
  0x1a   : > { %s3575_s29 = scalar_select %p2785_p11, 1, 0 }
  0x1b   : > { %s3576_s30 = scalar_select %p2789_p12, 1, 0 }
  0x1c   : > { %s2797_s7 = sshll.u32 %s2697_s21, 12  ;;  %s2800_s8 = sshll.u32 %s2794_s6, 8 }
  0x1d   : > { %p2802_p13 = pnand %p2305_p10, %p47_p5  ;;  %s227_s10 = sand.u32 1, %s2697_s21  }
  0x1e   : > { %s3578_s1 = sld [smem:[#allocation21_spill]]  ;;  %s231_s14 = scalar_lea.vmem [#allocation5], %s2800_s8 }
  0x1f   : > { %s239_s15 = sshll.u32 %s231_s14, 4  ;;  %s2817_s16 = scalar_lea.sflag [#allocation6], %s227_s10  ;;  %s2814_s15 = int_to_ptr.vmem [resolvable:$true] %s239_s15 }
  0x20   : > { %p2823_p2 = pneg %p2802_p13 }
  0x24   : > { %s2811_s13 = scalar_lea.hbm %s3578_s1, %s2797_s7  ;;  %s2476_s11 = scalar_lea.hbm %s3578_s1, 8192 }
  0x25   : > { %s2471_s17 = scalar_lea.hbm %s2811_s13, 4096  ;;  %p2477_p5 = scmp.lt.u32.totalorder %s2811_s13, %s3578_s1 }
  0x26   : > { %p2472_p1 = scmp.ne.s32.totalorder %s2811_s13, %s2471_s17  ;;  %p2478_p7 = scmp.lt.u32.totalorder %s2476_s11, %s2471_s17 }
  0x27   : > { %p2480_p10 = scmp.lt.u32.totalorder %s2471_s17, %s2811_s13 }
  0x28   : > { %p2474_p3 = pnand %p2823_p2, %p2472_p1  ;;  %p2479_p8 = por %p2478_p7, %p2477_p5 }
  0x2a   : > { %p2475_p4 = pneg %p2474_p3  ;;  %p2481_p9 = por %p2480_p10, %p2479_p8 }
  0x2c   : > { %p2482_p0 = pnand %p2481_p9, %p2475_p4 }
  0x2e   : > { %2485 = shalt.err (!%p2482_p0)
}
  0x2f   : > { %s2486_s10 = scalar_lea.vmem %s2814_s15, 4096  ;;  %s2699_s25 = smov [#allocation5]  }
  0x30   : > { %p2487_p1 = scmp.ne.s32.totalorder %s2814_s15, %s2486_s10  ;;  %s2491_s26 = sshll.u32 %s2699_s25, 4  ;;  %s2492_s26 = int_to_ptr.vmem [resolvable:$false] %s2491_s26 }
  0x31   : > { %s2493_s12 = scalar_lea.vmem %s2492_s26, 8192  ;;  %p2494_p11 = scmp.lt.s32.totalorder %s2814_s15, %s2492_s26 }
  0x32   : > { %p2489_p3 = pnand %p2487_p1, %p2823_p2  ;;  %p2495_p6 = scmp.lt.s32.totalorder %s2493_s12, %s2486_s10 }
  0x34   : > { %p2490_p12 = pneg %p2489_p3  ;;  %p2496_p5 = por %p2495_p6, %p2494_p11 }
  0x36   : > { %p2497_p7 = pnand %p2496_p5, %p2490_p12 }
  0x38   : > { %2500 = shalt.err (!%p2497_p7)
}
  0x39   : > { %s3565_s17 = smov 128   ;;  %s3567_s11 = smov 8  }
  0x3a   : > { %2291 = dma.hbm_to_vmem [thread:$0]  (!%p2802_p13), %s2811_s13, 4096, %s2814_s15, %s2817_s16, %s3565_s17, %s3565_s17, %s3567_s11  }
  0x3b   : > { %p291_p6 = scmp.lt.s32.totalorder %s2697_s21, 3  ;;  %s3580_s0 = sld [smem:[#allocation20_spill]] }
  0x3c   : > { %p3581_p9 = scmp.ge.s32.totalorder %s2697_s21, 1  ;;  %s209_s12 = scalar_lea.vmem [#allocation2], %s2800_s8 }
  0x3d   : > { %s217_s1 = sshll.u32 %s209_s12, 4  ;;  %s206_s13 = scalar_lea.sflag [#allocation3], %s2794_s6  ;;  %s2864_s1 = int_to_ptr.vmem [resolvable:$true] %s217_s1 }
  0x3e   : > { %p2859_p11 = pnand %p3581_p9, %p291_p6 }
  0x40   : > { %s3582_s26 = scalar_select %p2859_p11, 1, 0 }
  0x41   : > { %s2855_s25 = scalar_lea.hbm %s3580_s0, %s2797_s7  ;;  %s2506_s17 = scalar_lea.hbm %s3580_s0, 8192 }
  0x42   : > { %s2501_s15 = scalar_lea.hbm %s2855_s25, 4096  ;;  %p2507_p8 = scmp.lt.u32.totalorder %s2855_s25, %s3580_s0 }
  0x43   : > { %p2502_p12 = scmp.ne.s32.totalorder %s2855_s25, %s2501_s15  ;;  %p2508_p10 = scmp.lt.u32.totalorder %s2506_s17, %s2501_s15 }
  0x44   : > { %p2510_p3 = scmp.lt.u32.totalorder %s2501_s15, %s2855_s25 }
  0x45   : > { %p2504_p0 = pnand %p2502_p12, %p2823_p2  ;;  %p2509_p1 = por %p2508_p10, %p2507_p8 }
  0x47   : > { %p2505_p4 = pneg %p2504_p0  ;;  %p2511_p5 = por %p2510_p3, %p2509_p1 }
  0x49   : > { %p2512_p7 = pnand %p2511_p5, %p2505_p4 }
  0x4b   : > { %2515 = shalt.err (!%p2512_p7)
}
  0x4c   : > { %s2516_s12 = scalar_lea.vmem %s2864_s1, 4096  ;;  %s2702_s14 = smov [#allocation2]  }
  0x4d   : > { %p2517_p6 = scmp.ne.s32.totalorder %s2864_s1, %s2516_s12  ;;  %s2521_s10 = sshll.u32 %s2702_s14, 4  ;;  %s2522_s10 = int_to_ptr.vmem [resolvable:$false] %s2521_s10 }
  0x4e   : > { %s2523_s27 = scalar_lea.vmem %s2522_s10, 8192  ;;  %p2524_p0 = scmp.lt.s32.totalorder %s2864_s1, %s2522_s10 }
  0x4f   : > { %p2519_p9 = pnand %p2517_p6, %p2823_p2  ;;  %p2525_p11 = scmp.lt.s32.totalorder %s2523_s27, %s2516_s12 }
  0x51   : > { %p2520_p12 = pneg %p2519_p9  ;;  %p2526_p8 = por %p2525_p11, %p2524_p0 }
  0x53   : > { %p2527_p10 = pnand %p2526_p8, %p2520_p12 }
  0x55   : > { %2530 = shalt.err (!%p2527_p10)
}
  0x56   : > { %s3583_s17 = smov 8   ;;  %s3584_s11 = smov 128  }
  0x57   : > { %2288 = dma.hbm_to_vmem [thread:$0]  (!%p2802_p13), %s2855_s25, 4096, %s2864_s1, %s206_s13, %s3584_s11, %s3584_s11, %s3583_s17  }
  0x58   : > { %s2897_s12 = scalar_lea.hbm %s3559_s2, %s2797_s7  ;;  %s253_s10 = scalar_lea.vmem [#allocation7], %s2800_s8 }
  0x59   : > { %s261_s27 = sshll.u32 %s253_s10, 4  ;;  %s2531_s0 = scalar_lea.hbm %s2897_s12, 4096  ;;  %s2900_s27 = int_to_ptr.vmem [resolvable:$true] %s261_s27 }
  0x5a   : > { %p2532_p11 = scmp.ne.s32.totalorder %s2897_s12, %s2531_s0  ;;  %s2536_s25 = scalar_lea.hbm %s3559_s2, 8192 }
  0x5b   : > { %p2537_p3 = scmp.lt.u32.totalorder %s2897_s12, %s3559_s2  ;;  %p2538_p5 = scmp.lt.u32.totalorder %s2536_s25, %s2531_s0 }
  0x5c   : > { %p2534_p4 = pnand %p2532_p11, %p2823_p2  ;;  %p2540_p6 = scmp.lt.u32.totalorder %s2531_s0, %s2897_s12 }
  0x5d   : > { %p2539_p7 = por %p2538_p5, %p2537_p3 }
  0x5e   : > { %p2535_p1 = pneg %p2534_p4 }
  0x5f   : > { %p2541_p9 = por %p2540_p6, %p2539_p7 }
  0x61   : > { %p2542_p12 = pnand %p2541_p9, %p2535_p1 }
  0x63   : > { %2545 = shalt.err (!%p2542_p12)
}
  0x64   : > { %s2546_s14 = scalar_lea.vmem %s2900_s27, 4096  ;;  %s2703_s20 = smov [#allocation7]  }
  0x65   : > { %p2547_p0 = scmp.ne.s32.totalorder %s2900_s27, %s2546_s14  ;;  %s2551_s10 = sshll.u32 %s2703_s20, 4  ;;  %s2552_s10 = int_to_ptr.vmem [resolvable:$false] %s2551_s10 }
  0x66   : > { %s2553_s1 = scalar_lea.vmem %s2552_s10, 8192  ;;  %p2554_p11 = scmp.lt.s32.totalorder %s2900_s27, %s2552_s10 }
  0x67   : > { %p2549_p8 = pnand %p2547_p0, %p2823_p2  ;;  %p2555_p4 = scmp.lt.s32.totalorder %s2553_s1, %s2546_s14 }
  0x69   : > { %p2550_p10 = pneg %p2549_p8  ;;  %p2556_p3 = por %p2555_p4, %p2554_p11 }
  0x6b   : > { %p2557_p5 = pnand %p2556_p3, %p2550_p10 }
  0x6d   : > { %2560 = shalt.err (!%p2557_p5)
}
  0x6e   : > { %2294 = dma.hbm_to_vmem [thread:$0]  (!%p2802_p13), %s2897_s12, 4096, %s2900_s27, %s2817_s16, %s3584_s11, %s3584_s11, %s3583_s17  }
  0x6f   : > { %s2931_s13 = scalar_lea.hbm %s3560_s3, %s2797_s7  ;;  %s275_s15 = scalar_lea.vmem [#allocation8], %s2800_s8 }
  0x70   : > { %s283_s14 = sshll.u32 %s275_s15, 4  ;;  %s272_s20 = scalar_lea.sflag [#allocation9], %s2794_s6  ;;  %s2934_s14 = int_to_ptr.vmem [resolvable:$true] %s283_s14 }
  0x71   : > { %s2561_s10 = scalar_lea.hbm %s2931_s13, 4096  ;;  %s2566_s27 = scalar_lea.hbm %s3560_s3, 8192 }
  0x72   : > { %p2562_p1 = scmp.ne.s32.totalorder %s2931_s13, %s2561_s10  ;;  %p2567_p9 = scmp.lt.u32.totalorder %s2931_s13, %s3560_s3 }
  0x73   : > { %p2568_p12 = scmp.lt.u32.totalorder %s2566_s27, %s2561_s10  ;;  %p2570_p8 = scmp.lt.u32.totalorder %s2561_s10, %s2931_s13 }
  0x74   : > { %p2564_p7 = pnand %p2562_p1, %p2823_p2 }
  0x75   : > { %p2569_p0 = por %p2568_p12, %p2567_p9 }
  0x76   : > { %p2565_p6 = pneg %p2564_p7 }
  0x77   : > { %p2571_p10 = por %p2570_p8, %p2569_p0 }
  0x79   : > { %p2572_p11 = pnand %p2571_p10, %p2565_p6 }
  0x7b   : > { %2575 = shalt.err (!%p2572_p11)
}
  0x7c   : > { %s2576_s8 = scalar_lea.vmem %s2934_s14, 4096  ;;  %s2704_s0 = smov [#allocation8]  }
  0x7d   : > { %p2577_p4 = scmp.ne.s32.totalorder %s2934_s14, %s2576_s8  ;;  %s2581_s25 = sshll.u32 %s2704_s0, 4  ;;  %s2582_s25 = int_to_ptr.vmem [resolvable:$false] %s2581_s25 }
  0x7e   : > { %s2583_s15 = scalar_lea.vmem %s2582_s25, 8192  ;;  %p2584_p1 = scmp.lt.s32.totalorder %s2934_s14, %s2582_s25 }
  0x7f   : > { %p2579_p3 = pnand %p2577_p4, %p2823_p2  ;;  %p2585_p7 = scmp.lt.s32.totalorder %s2583_s15, %s2576_s8 }
  0x81   : > { %p2580_p5 = pneg %p2579_p3  ;;  %p2586_p9 = por %p2585_p7, %p2584_p1 }
  0x83   : > { %p2587_p12 = pnand %p2586_p9, %p2580_p5 }
  0x85   : > { %2590 = shalt.err (!%p2587_p12)
}
  0x86   : > { %2297 = dma.hbm_to_vmem [thread:$0]  (!%p2802_p13), %s2931_s13, 4096, %s2934_s14, %s272_s20, %s3584_s11, %s3584_s11, %s3583_s17  }
  0x87   : > { %p3585_p2 = scmp.ne.s32.totalorder %s3582_s26, 0 }
  0x88   : > { %s2966_s23 = sand.u32 (!%p3585_p2), 1, %s2689_s19   ;;  %p3586_p6 = scmp.ne.s32.totalorder (!%p3585_p2), %s3574_s28, 0 }
  0x89   : > { %295 = sbr.rel (%p3585_p2) target bundleno = 1036 (0x40c), region = 36  ;;  %s2969_s10 = sshll.u32 (!%p3585_p2), %s2966_s23, 8 }
  0x8a   : > { %s298_s9 = scalar_lea.sflag (!%p3585_p2), [#allocation3], %s2966_s23  ;;  %s2973_s16 = scalar_lea.vmem (!%p3585_p2), [#allocation2], %s2969_s10 }
  0x90   : > { %2664 = dma.done.wait (%p3586_p6), %s298_s9, 4096  }
  0x91   : > { %2666 = vsyncadd (%p3586_p6), %s298_s9, 4294963200  ;;  %s306_s6 = sand.u32 1, %s2760_s22   ;;  %s2981_s17 = scalar_lea.vmem [#allocation5], %s2969_s10 }
  0x92   : > { %s307_s26 = scalar_lea.sflag [#allocation6], %s306_s6 }
  0x93   : > { %2668 = dma.done.wait (%p3586_p6), %s307_s26, 8192  }
  0x94   : > { %2670 = vsyncadd (%p3586_p6), %s307_s26, 4294959104  ;;  %s2988_s11 = scalar_lea.vmem [#allocation7], %s2969_s10  ;;  %s325_s13 = scalar_lea.sflag [#allocation9], %s2966_s23 }
  0x95   : > { %s2992_s14 = scalar_lea.vmem [#allocation8], %s2969_s10 }
  0x96   : > { %2672 = dma.done.wait (%p3586_p6), %s325_s13, 4096  }
  0x97   : > { %2674 = vsyncadd (%p3586_p6), %s325_s13, 4294963200  ;;  %v413_v0 = vld [vmem:[%s2981_s17] sm:$0xff]  ;;  %v414_v1 = vld [vmem:[%s2981_s17 + $0x8] sm:$0xff]  ;;  %s3364_s28 = scalar_lea.vmem [#allocation11], %s2969_s10  ;;  %s1790_s20 = sshll.u32 %s2760_s22, 12 }
  0x98   : > { %v429_v2 = vld [vmem:[%s2981_s17 + $0x80] sm:$0xff]  ;;  %v2145_v3 = vpack.c.bf16 %v414_v1, %v413_v0  ;;  %v430_v4 = vld [vmem:[%s2981_s17 + $0x88] sm:$0xff]  ;;  %v415_v5 = vld [vmem:[%s2981_s17 + $0x10] sm:$0xff]  ;;  %s3435_s7 = scalar_lea.hbm %s3562_s5, %s1790_s20  ;;  %s1574_s1 = sshll.u32 %s3364_s28, 4  ;;  %s3438_s1 = int_to_ptr.vmem [resolvable:$true] %s1574_s1 }
  0x99   : > { %v416_v6 = vld [vmem:[%s2981_s17 + $0x18] sm:$0xff]  ;;  %v2177_v7 = vpack.c.bf16 %v430_v4, %v429_v2  ;;  %v431_v9 = vld [vmem:[%s2981_s17 + $0x90] sm:$0xff]  ;;  %v417_v12 = vld [vmem:[%s2981_s17 + $0x20] sm:$0xff]  ;;  %s1543_s8 = scalar_lea.sflag [#allocation12], %s2966_s23  ;;  %s2591_s0 = scalar_lea.vmem %s3438_s1, 4096 }
  0x9a   : > { %v2149_v8 = vpack.c.bf16 %v416_v6, %v415_v5  ;;  %v432_v10 = vld [vmem:[%s2981_s17 + $0x98] sm:$0xff]  ;;  %2146 = vmatprep.subr.bf16.mxu0 %v2145_v3  ;;  %v418_v13 = vld [vmem:[%s2981_s17 + $0x28] sm:$0xff]  ;;  %v433_v14 = vld [vmem:[%s2981_s17 + $0xa0] sm:$0xff]  ;;  %p2592_p13 = scmp.ne.s32.totalorder %s3438_s1, %s2591_s0  ;;  %p3587_p0 = scmp.ne.s32.totalorder %s3575_s29, 0 }
  0x9b   : > { %v2181_v11 = vpack.c.bf16 %v432_v10, %v431_v9  ;;  %2148 = vmatpush3.bf16.xpose.msra.mxu0 %v2145_v3  ;;  %2178 = vmatprep.subr.bf16.mxu1 %v2177_v7  ;;  %v434_v15 = vld [vmem:[%s2981_s17 + $0xa8] sm:$0xff]  ;;  %v2153_v16 = vpack.c.bf16 %v418_v13, %v417_v12  ;;  %v381_v18 = vld [vmem:[%s2973_s16] sm:$0xff]  ;;  %v419_v20 = vld [vmem:[%s2981_s17 + $0x30] sm:$0xff]  ;;  %s2705_s25 = smov [#allocation11]  }
  0x9c   : > { %2180 = vmatpush3.bf16.xpose.msra.mxu1 %v2177_v7  ;;  %2150 = vmatprep.subr.bf16.mxu0 %v2149_v8  ;;  %v2185_v17 = vpack.c.bf16 %v434_v15, %v433_v14  ;;  %v397_v19 = vld [vmem:[%s2973_s16 + $0x80] sm:$0xff]  ;;  %v420_v21 = vld [vmem:[%s2981_s17 + $0x38] sm:$0xff]  ;;  %v435_v22 = vld [vmem:[%s2981_s17 + $0xb0] sm:$0xff]  ;;  %p2593_p8 = pnand %p2592_p13, %p3587_p0  ;;  %s2595_s15 = sshll.u32 %s2705_s25, 4  ;;  %s2596_s15 = int_to_ptr.vmem [resolvable:$false] %s2595_s15 }
  0x9d   : > { %2182 = vmatprep.subr.bf16.mxu1 %v2181_v11  ;;  %1953 = vmatprep.mubr.f32.mxu0 %v381_v18  ;;  %v436_v23 = vld [vmem:[%s2981_s17 + $0xb8] sm:$0xff]  ;;  %v2157_v24 = vpack.c.bf16 %v420_v21, %v419_v20  ;;  %v421_v26 = vld [vmem:[%s2981_s17 + $0x40] sm:$0xff]  ;;  %v422_v27 = vld [vmem:[%s2981_s17 + $0x48] sm:$0xff]  ;;  %s2597_s9 = scalar_lea.vmem %s2596_s15, 8192  ;;  %p2598_p11 = scmp.lt.s32.totalorder %s3438_s1, %s2596_s15 }
  0x9e   : > { %2009 = vmatprep.mubr.f32.mxu1 %v397_v19  ;;  %v2189_v25 = vpack.c.bf16 %v436_v23, %v435_v22  ;;  %v437_v28 = vld [vmem:[%s2981_s17 + $0xc0] sm:$0xff]  ;;  %v438_v29 = vld [vmem:[%s2981_s17 + $0xc8] sm:$0xff]  ;;  %v2161_v30 = vpack.c.bf16 %v422_v27, %v421_v26  ;;  %v423_v32 = vld [vmem:[%s2981_s17 + $0x50] sm:$0xff]  ;;  %p2594_p10 = pneg %p2593_p8  ;;  %p2599_p4 = scmp.lt.s32.totalorder %s2597_s9, %s2591_s0 }
  0x9f   : > { %v2193_v31 = vpack.c.bf16 %v438_v29, %v437_v28  ;;  %v424_v33 = vld [vmem:[%s2981_s17 + $0x58] sm:$0xff]  ;;  %v439_v34 = vld [vmem:[%s2981_s17 + $0xd0] sm:$0xff]  ;;  %v425_v38 = vld [vmem:[%s2981_s17 + $0x60] sm:$0xff] }
  0xa0   : > { %v440_v35 = vld [vmem:[%s2981_s17 + $0xd8] sm:$0xff]  ;;  %v2165_v36 = vpack.c.bf16 %v424_v33, %v423_v32  ;;  %v426_v39 = vld [vmem:[%s2981_s17 + $0x68] sm:$0xff]  ;;  %v441_v40 = vld [vmem:[%s2981_s17 + $0xe0] sm:$0xff]  ;;  %p2600_p3 = por %p2599_p4, %p2598_p11 }
  0xa1   : > { %v2197_v37 = vpack.c.bf16 %v440_v35, %v439_v34  ;;  %v442_v41 = vld [vmem:[%s2981_s17 + $0xe8] sm:$0xff]  ;;  %v2169_v42 = vpack.c.bf16 %v426_v39, %v425_v38  ;;  %v427_v44 = vld [vmem:[%s2981_s17 + $0x70] sm:$0xff]  ;;  %v428_v45 = vld [vmem:[%s2981_s17 + $0x78] sm:$0xff] }
  0xa2   : > { %v2201_v43 = vpack.c.bf16 %v442_v41, %v441_v40  ;;  %v443_v46 = vld [vmem:[%s2981_s17 + $0xf0] sm:$0xff]  ;;  %v444_v47 = vld [vmem:[%s2981_s17 + $0xf8] sm:$0xff]  ;;  %v2173_v48 = vpack.c.bf16 %v428_v45, %v427_v44  ;;  %v382_v50 = vld [vmem:[%s2973_s16 + $0x8] sm:$0xff]  ;;  %p2601_p5 = pnand %p2600_p3, %p2594_p10 }
  0xa3   : > { %2152 = vmatpush3.bf16.xpose.msra.mxu0 %v2149_v8  ;;  %v2205_v49 = vpack.c.bf16 %v444_v47, %v443_v46  ;;  %v398_v51 = vld [vmem:[%s2973_s16 + $0x88] sm:$0xff]  ;;  %v383_v52 = vld [vmem:[%s2973_s16 + $0x10] sm:$0xff]  ;;  %v384_v54 = vld [vmem:[%s2973_s16 + $0x18] sm:$0xff] }
  0xa4   : > { %2184 = vmatpush3.bf16.xpose.msra.mxu1 %v2181_v11  ;;  %2154 = vmatprep.subr.bf16.mxu0 %v2153_v16  ;;  %v399_v53 = vld [vmem:[%s2973_s16 + $0x90] sm:$0xff]  ;;  %v400_v55 = vld [vmem:[%s2973_s16 + $0x98] sm:$0xff]  ;;  %v385_v56 = vld [vmem:[%s2973_s16 + $0x20] sm:$0xff] }
  0xa5   : > { %2186 = vmatprep.subr.bf16.mxu1 %v2185_v17  ;;  %v401_v57 = vld [vmem:[%s2973_s16 + $0xa0] sm:$0xff]  ;;  %v386_v58 = vld [vmem:[%s2973_s16 + $0x28] sm:$0xff]  ;;  %v387_v60 = vld [vmem:[%s2973_s16 + $0x30] sm:$0xff] }
  0xa6   : > { %v402_v59 = vld [vmem:[%s2973_s16 + $0xa8] sm:$0xff]  ;;  %v403_v61 = vld [vmem:[%s2973_s16 + $0xb0] sm:$0xff]  ;;  %v388_v62 = vld [vmem:[%s2973_s16 + $0x38] sm:$0xff] }
  0xa7   : > { %v404_v63 = vld [vmem:[%s2973_s16 + $0xb8] sm:$0xff]  ;;  %v389_v0 = vld [vmem:[%s2973_s16 + $0x40] sm:$0xff]  ;;  %v390_v2 = vld [vmem:[%s2973_s16 + $0x48] sm:$0xff] }
  0xa8   : > { %v405_v1 = vld [vmem:[%s2973_s16 + $0xc0] sm:$0xff]  ;;  %v406_v3 = vld [vmem:[%s2973_s16 + $0xc8] sm:$0xff]  ;;  %v391_v4 = vld [vmem:[%s2973_s16 + $0x50] sm:$0xff] }
  0xa9   : > { %v407_v5 = vld [vmem:[%s2973_s16 + $0xd0] sm:$0xff]  ;;  %v392_v6 = vld [vmem:[%s2973_s16 + $0x58] sm:$0xff]  ;;  %v393_v8 = vld [vmem:[%s2973_s16 + $0x60] sm:$0xff] }
  0xaa   : > { %v408_v7 = vld [vmem:[%s2973_s16 + $0xd8] sm:$0xff]  ;;  %v409_v9 = vld [vmem:[%s2973_s16 + $0xe0] sm:$0xff]  ;;  %v394_v10 = vld [vmem:[%s2973_s16 + $0x68] sm:$0xff] }
  0xab   : > { %2156 = vmatpush3.bf16.xpose.msra.mxu0 %v2153_v16  ;;  %v410_v11 = vld [vmem:[%s2973_s16 + $0xe8] sm:$0xff]  ;;  %v395_v12 = vld [vmem:[%s2973_s16 + $0x70] sm:$0xff]  ;;  %v396_v14 = vld [vmem:[%s2973_s16 + $0x78] sm:$0xff] }
  0xac   : > { %2188 = vmatpush3.bf16.xpose.msra.mxu1 %v2185_v17  ;;  %2158 = vmatprep.subr.bf16.mxu0 %v2157_v24  ;;  %v411_v13 = vld [vmem:[%s2973_s16 + $0xf0] sm:$0xff]  ;;  %v412_v15 = vld [vmem:[%s2973_s16 + $0xf8] sm:$0xff]  ;;  %v800_v16 = vld [vmem:[%s2992_s14 + $0x8] sm:$0xff] }
  0xad   : > { %2190 = vmatprep.subr.bf16.mxu1 %v2189_v25  ;;  %v799_v17 = vld [vmem:[%s2992_s14] sm:$0xff]  ;;  %v816_v18 = vld [vmem:[%s2992_s14 + $0x88] sm:$0xff]  ;;  %vm832_vm0 = vcmp.gt.f32.partialorder %v800_v16, 0.0  ;;  %v818_v29 = vld [vmem:[%s2992_s14 + $0x98] sm:$0xff] }
  0xae   : > { %v815_v19 = vld [vmem:[%s2992_s14 + $0x80] sm:$0xff]  ;;  %vm831_vm1 = vcmp.gt.f32.partialorder %v799_v17, 0.0  ;;  %vm848_vm2 = vcmp.gt.f32.partialorder %v816_v18, 0.0  ;;  %v802_v32 = vld [vmem:[%s2992_s14 + $0x18] sm:$0xff]  ;;  %vm850_vm4 = vcmp.gt.f32.partialorder %v818_v29, 0.0  ;;  %v817_v40 = vld [vmem:[%s2992_s14 + $0x90] sm:$0xff] }
  0xaf   : > { %vm847_vm3 = vcmp.gt.f32.partialorder %v815_v19, 0.0  ;;  %vm834_vm5 = vcmp.gt.f32.partialorder %v802_v32, 0.0  ;;  %v801_v41 = vld [vmem:[%s2992_s14 + $0x10] sm:$0xff]  ;;  %vm849_vm6 = vcmp.gt.f32.partialorder %v817_v40, 0.0  ;;  %v823_v40 = vld [vmem:[%s2992_s14 + $0xc0] sm:$0xff] }
  0xb0   : > { %vm833_vm7 = vcmp.gt.f32.partialorder %v801_v41, 0.0  ;;  %v821_v16 = vld [vmem:[%s2992_s14 + $0xb0] sm:$0xff]  ;;  %v807_v41 = vld [vmem:[%s2992_s14 + $0x40] sm:$0xff] }
  0xb1   : > { %v805_v17 = vld [vmem:[%s2992_s14 + $0x30] sm:$0xff]  ;;  %vm853_vm14 = vcmp.gt.f32.partialorder %v821_v16, 0.0 }
  0xb2   : > { %vm837_vm15 = vcmp.gt.f32.partialorder %v805_v17, 0.0 }
  0xb3   : > { %2160 = vmatpush3.bf16.xpose.msra.mxu0 %v2157_v24 }
  0xb4   : > { %2192 = vmatpush3.bf16.xpose.msra.mxu1 %v2189_v25  ;;  %2162 = vmatprep.subr.bf16.mxu0 %v2161_v30 }
  0xb5   : > { %2194 = vmatprep.subr.bf16.mxu1 %v2193_v31 }
  0xbb   : > { %2164 = vmatpush3.bf16.xpose.msra.mxu0 %v2161_v30 }
  0xbc   : > { %2196 = vmatpush3.bf16.xpose.msra.mxu1 %v2193_v31  ;;  %2166 = vmatprep.subr.bf16.mxu0 %v2165_v36 }
  0xbd   : > { %2198 = vmatprep.subr.bf16.mxu1 %v2197_v37 }
  0xc3   : > { %2168 = vmatpush3.bf16.xpose.msra.mxu0 %v2165_v36 }
  0xc4   : > { %2200 = vmatpush3.bf16.xpose.msra.mxu1 %v2197_v37  ;;  %2170 = vmatprep.subr.bf16.mxu0 %v2169_v42 }
  0xc5   : > { %2202 = vmatprep.subr.bf16.mxu1 %v2201_v43 }
  0xcb   : > { %2172 = vmatpush3.bf16.xpose.msra.mxu0 %v2169_v42 }
  0xcc   : > { %2204 = vmatpush3.bf16.xpose.msra.mxu1 %v2201_v43  ;;  %2174 = vmatprep.subr.bf16.mxu0 %v2173_v48 }
  0xcd   : > { %2206 = vmatprep.subr.bf16.mxu1 %v2205_v49 }
  0xd3   : > { %2176 = vmatpush3.bf16.xpose.msra.mxu0 %v2173_v48 }
  0xd4   : > { %2208 = vmatpush3.bf16.xpose.msra.mxu1 %v2205_v49 }
  0xda   : > { %1954 = vmatmul.mubr.f32.vlgmr.msra.gmra.mrb[0].mxu0 %v382_v50  ;;  %v820_v50 = vld [vmem:[%s2992_s14 + $0xa8] sm:$0xff] }
  0xdb   : > { %2010 = vmatmul.mubr.f32.vlgmr.msra.gmra.mrb[0].mxu1 %v398_v51  ;;  %1956 = vmatprep.mubr.f32.mxu0 %v383_v52  ;;  %v804_v51 = vld [vmem:[%s2992_s14 + $0x28] sm:$0xff]  ;;  %vm852_vm8 = vcmp.gt.f32.partialorder %v820_v50, 0.0 }
  0xdc   : > { %2012 = vmatprep.mubr.f32.mxu1 %v399_v53  ;;  %vm836_vm9 = vcmp.gt.f32.partialorder %v804_v51, 0.0 }
  0xde   : > { %1957 = vmatmul.mubr.f32.gmra.mrb[2].mxu0 %v384_v54 }
  0xdf   : > { %2013 = vmatmul.mubr.f32.gmra.mrb[2].mxu1 %v400_v55  ;;  %1959 = vmatprep.mubr.f32.mxu0 %v385_v56 }
  0xe0   : > { %2015 = vmatprep.mubr.f32.mxu1 %v401_v57 }
  0xe2   : > { %1960 = vmatmul.mubr.f32.gmra.mrb[4].mxu0 %v386_v58 }
  0xe3   : > { %2016 = vmatmul.mubr.f32.gmra.mrb[4].mxu1 %v402_v59  ;;  %1962 = vmatprep.mubr.f32.mxu0 %v387_v60  ;;  %v819_v60 = vld [vmem:[%s2992_s14 + $0xa0] sm:$0xff] }
  0xe4   : > { %2018 = vmatprep.mubr.f32.mxu1 %v403_v61  ;;  %v803_v61 = vld [vmem:[%s2992_s14 + $0x20] sm:$0xff]  ;;  %vm851_vm10 = vcmp.gt.f32.partialorder %v819_v60, 0.0 }
  0xe5   : > { %vm835_vm11 = vcmp.gt.f32.partialorder %v803_v61, 0.0 }
  0xe6   : > { %1963 = vmatmul.mubr.f32.gmra.mrb[6].mxu0 %v388_v62 }
  0xe7   : > { %2019 = vmatmul.mubr.f32.gmra.mrb[6].mxu1 %v404_v63  ;;  %1965 = vmatprep.mubr.f32.mxu0 %v389_v0 }
  0xe8   : > { %2021 = vmatprep.mubr.f32.mxu1 %v405_v1 }
  0xea   : > { %1966 = vmatmul.mubr.f32.gmra.mrb[8].mxu0 %v390_v2 }
  0xeb   : > { %2022 = vmatmul.mubr.f32.gmra.mrb[8].mxu1 %v406_v3  ;;  %1968 = vmatprep.mubr.f32.mxu0 %v391_v4 }
  0xec   : > { %2024 = vmatprep.mubr.f32.mxu1 %v407_v5 }
  0xee   : > { %1969 = vmatmul.mubr.f32.gmra.mrb[10].mxu0 %v392_v6  ;;  %v822_v6 = vld [vmem:[%s2992_s14 + $0xb8] sm:$0xff] }
  0xef   : > { %2025 = vmatmul.mubr.f32.gmra.mrb[10].mxu1 %v408_v7  ;;  %1971 = vmatprep.mubr.f32.mxu0 %v393_v8  ;;  %v806_v7 = vld [vmem:[%s2992_s14 + $0x38] sm:$0xff]  ;;  %vm854_vm12 = vcmp.gt.f32.partialorder %v822_v6, 0.0  ;;  %v827_v6 = vld [vmem:[%s2992_s14 + $0xe0] sm:$0xff] }
  0xf0   : > { %2027 = vmatprep.mubr.f32.mxu1 %v409_v9  ;;  %vm838_vm13 = vcmp.gt.f32.partialorder %v806_v7, 0.0  ;;  %v811_v7 = vld [vmem:[%s2992_s14 + $0x60] sm:$0xff] }
  0xf2   : > { %1972 = vmatmul.mubr.f32.gmra.mrb[12].mxu0 %v394_v10 }
  0xf3   : > { %2028 = vmatmul.mubr.f32.gmra.mrb[12].mxu1 %v410_v11  ;;  %1974 = vmatprep.mubr.f32.mxu0 %v395_v12 }
  0xf4   : > { %2030 = vmatprep.mubr.f32.mxu1 %v411_v13 }
  0xf6   : > { %1975 = vmatmul.mubr.f32.gmra.mrb[14].mxu0 %v396_v14 }
  0xf7   : > { %2031 = vmatmul.mubr.f32.gmra.mrb[14].mxu1 %v412_v15 }
 0x1ad   : > { %v1955_v20 = vpop.f32.mrb[0].mxu0 }
 0x1ae   : > { %v768_v21 = vmul.f32 0.088388346, %v1955_v20  ;;  %v543_v22 = vpop.f32.mrb[1].mxu0  ;;  %v2011_v23 = vpop.f32.mrb[0].mxu1 }
 0x1af   : > { %v767_v24 = vmul.f32 0.088388346, %v543_v22  ;;  %v784_v25 = vmul.f32 0.088388346, %v2011_v23  ;;  %v688_v26 = vpop.f32.mrb[1].mxu1 }
 0x1b0   : > { %v783_v27 = vmul.f32 0.088388346, %v688_v26  ;;  %v3066_v28 = vsel %vm832_vm0, -1e+30, %v768_v21  ;;  %v824_v26 = vld [vmem:[%s2992_s14 + $0xc8] sm:$0xff] }
 0x1b1   : > { %897 = vmax.xlane.f32.xlu1 %v3066_v28  ;;  %v3070_v30 = vsel %vm831_vm1, -1e+30, %v767_v24  ;;  %v1958_v31 = vpop.f32.mrb[2].mxu0  ;;  %v3074_v34 = vsel %vm848_vm2, -1e+30, %v784_v25  ;;  %vm856_vm0 = vcmp.gt.f32.partialorder %v824_v26, 0.0 }
 0x1b2   : > { %895 = vmax.xlane.f32.xlu0 %v3070_v30  ;;  %v2014_v33 = vpop.f32.mrb[2].mxu1  ;;  %v3076_v35 = vsel %vm847_vm3, -1e+30, %v783_v27  ;;  %v553_v36 = vpop.f32.mrb[3].mxu0  ;;  %v770_v38 = vmul.f32 0.088388346, %v1958_v31 }
 0x1b3   : > { %v786_v37 = vmul.f32 0.088388346, %v2014_v33  ;;  %v698_v39 = vpop.f32.mrb[3].mxu1  ;;  %v769_v47 = vmul.f32 0.088388346, %v553_v36  ;;  %v808_v27 = vld [vmem:[%s2992_s14 + $0x48] sm:$0xff] }
 0x1b4   : > { %v785_v43 = vmul.f32 0.088388346, %v698_v39  ;;  %v3084_v48 = vsel %vm834_vm5, -1e+30, %v770_v38  ;;  %vm840_vm1 = vcmp.gt.f32.partialorder %v808_v27, 0.0  ;;  %vm855_vm2 = vcmp.gt.f32.partialorder %v823_v40, 0.0 }
 0x1b5   : > { %929 = vmax.xlane.f32.xlu1 %v3074_v34  ;;  %v1961_v42 = vpop.f32.mrb[4].mxu0  ;;  %v3082_v44 = vsel %vm850_vm4, -1e+30, %v786_v37  ;;  %v3092_v57 = vsel %vm833_vm7, -1e+30, %v769_v47  ;;  %vm839_vm3 = vcmp.gt.f32.partialorder %v807_v41, 0.0 }
 0x1b6   : > { %927 = vmax.xlane.f32.xlu0 %v3076_v35  ;;  %v2017_v45 = vpop.f32.mrb[4].mxu1  ;;  %v563_v46 = vpop.f32.mrb[5].mxu0  ;;  %v3090_v54 = vsel %vm849_vm6, -1e+30, %v785_v43  ;;  %v772_v58 = vmul.f32 0.088388346, %v1961_v42 }
 0x1b7   : > { %v708_v49 = vpop.f32.mrb[5].mxu1  ;;  %v788_v53 = vmul.f32 0.088388346, %v2017_v45  ;;  %v771_v3 = vmul.f32 0.088388346, %v563_v46  ;;  %v826_v47 = vld [vmem:[%s2992_s14 + $0xd8] sm:$0xff] }
 0x1b8   : > { %v787_v63 = vmul.f32 0.088388346, %v708_v49  ;;  %v3100_v4 = vsel %vm836_vm9, -1e+30, %v772_v58  ;;  %v810_v49 = vld [vmem:[%s2992_s14 + $0x58] sm:$0xff]  ;;  %vm858_vm4 = vcmp.gt.f32.partialorder %v826_v47, 0.0 }
 0x1b9   : > { %933 = vmax.xlane.f32.xlu1 %v3082_v44  ;;  %v1964_v52 = vpop.f32.mrb[6].mxu0  ;;  %v3098_v0 = vsel %vm852_vm8, -1e+30, %v788_v53  ;;  %v3108_v13 = vsel %vm835_vm11, -1e+30, %v771_v3  ;;  %vm842_vm5 = vcmp.gt.f32.partialorder %v810_v49, 0.0 }
 0x1ba   : > { %901 = vmax.xlane.f32.xlu0 %v3084_v48  ;;  %v2020_v55 = vpop.f32.mrb[6].mxu1  ;;  %v573_v56 = vpop.f32.mrb[7].mxu0  ;;  %v3106_v10 = vsel %vm851_vm10, -1e+30, %v787_v63  ;;  %v774_v14 = vmul.f32 0.088388346, %v1964_v52 }
 0x1bb   : > { %v718_v59 = vpop.f32.mrb[7].mxu1  ;;  %v790_v9 = vmul.f32 0.088388346, %v2020_v55  ;;  %v773_v23 = vmul.f32 0.088388346, %v573_v56  ;;  %v825_v55 = vld [vmem:[%s2992_s14 + $0xd0] sm:$0xff] }
 0x1bc   : > { %v789_v19 = vmul.f32 0.088388346, %v718_v59  ;;  %v3118_v24 = vsel %vm838_vm13, -1e+30, %v774_v14  ;;  %v809_v56 = vld [vmem:[%s2992_s14 + $0x50] sm:$0xff]  ;;  %vm857_vm6 = vcmp.gt.f32.partialorder %v825_v55, 0.0 }
 0x1bd   : > { %931 = vmax.xlane.f32.xlu1 %v3090_v54  ;;  %v1967_v62 = vpop.f32.mrb[8].mxu0  ;;  %v3114_v20 = vsel %vm854_vm12, -1e+30, %v790_v9  ;;  %v3132_v37 = vsel %vm837_vm15, -1e+30, %v773_v23  ;;  %vm841_vm7 = vcmp.gt.f32.partialorder %v809_v56, 0.0 }
 0x1be   : > { %899 = vmax.xlane.f32.xlu0 %v3092_v57  ;;  %v2023_v1 = vpop.f32.mrb[8].mxu1  ;;  %v583_v2 = vpop.f32.mrb[9].mxu0  ;;  %v3126_v32 = vsel %vm853_vm14, -1e+30, %v789_v19  ;;  %v776_v38 = vmul.f32 0.088388346, %v1967_v62 }
 0x1bf   : > { %v728_v5 = vpop.f32.mrb[9].mxu1  ;;  %v792_v31 = vmul.f32 0.088388346, %v2023_v1  ;;  %v775_v45 = vmul.f32 0.088388346, %v583_v2  ;;  %v828_v62 = vld [vmem:[%s2992_s14 + $0xe8] sm:$0xff] }
 0x1c0   : > { %v791_v42 = vmul.f32 0.088388346, %v728_v5  ;;  %v3140_v46 = vsel %vm840_vm1, -1e+30, %v776_v38  ;;  %v812_v63 = vld [vmem:[%s2992_s14 + $0x68] sm:$0xff]  ;;  %vm860_vm8 = vcmp.gt.f32.partialorder %v828_v62, 0.0 }
 0x1c1   : > { %937 = vmax.xlane.f32.xlu1 %v3098_v0  ;;  %v1970_v8 = vpop.f32.mrb[10].mxu0  ;;  %v3138_v43 = vsel %vm856_vm0, -1e+30, %v792_v31  ;;  %v3148_v52 = vsel %vm839_vm3, -1e+30, %v775_v45  ;;  %vm844_vm9 = vcmp.gt.f32.partialorder %v812_v63, 0.0 }
 0x1c2   : > { %905 = vmax.xlane.f32.xlu0 %v3100_v4  ;;  %v2026_v11 = vpop.f32.mrb[10].mxu1  ;;  %v593_v12 = vpop.f32.mrb[11].mxu0  ;;  %v3146_v51 = vsel %vm855_vm2, -1e+30, %v791_v42  ;;  %v778_v53 = vmul.f32 0.088388346, %v1970_v8 }
 0x1c3   : > { %v738_v15 = vpop.f32.mrb[11].mxu1  ;;  %v794_v50 = vmul.f32 0.088388346, %v2026_v11  ;;  %v777_v60 = vmul.f32 0.088388346, %v593_v12  ;;  %vm859_vm10 = vcmp.gt.f32.partialorder %v827_v6, 0.0 }
 0x1c4   : > { %v793_v58 = vmul.f32 0.088388346, %v738_v15  ;;  %v3156_v61 = vsel %vm842_vm5, -1e+30, %v778_v53  ;;  %vm843_vm11 = vcmp.gt.f32.partialorder %v811_v7, 0.0  ;;  %v829_v14 = vld [vmem:[%s2992_s14 + $0xf0] sm:$0xff] }
 0x1c5   : > { %935 = vmax.xlane.f32.xlu1 %v3106_v10  ;;  %v1973_v18 = vpop.f32.mrb[12].mxu0  ;;  %v3154_v59 = vsel %vm858_vm4, -1e+30, %v794_v50  ;;  %v3164_v3 = vsel %vm841_vm7, -1e+30, %v777_v60  ;;  %v813_v15 = vld [vmem:[%s2992_s14 + $0x70] sm:$0xff] }
 0x1c6   : > { %903 = vmax.xlane.f32.xlu0 %v3108_v13  ;;  %v2029_v21 = vpop.f32.mrb[12].mxu1  ;;  %v3116_v22 = vpop.f32.mrb[13].mxu0  ;;  %v3162_v2 = vsel %vm857_vm6, -1e+30, %v793_v58  ;;  %v780_v5 = vmul.f32 0.088388346, %v1973_v18 }
 0x1c7   : > { %v748_v25 = vpop.f32.mrb[13].mxu1  ;;  %v796_v1 = vmul.f32 0.088388346, %v2029_v21  ;;  %v779_v11 = vmul.f32 0.088388346, %v3116_v22  ;;  %vm861_vm12 = vcmp.gt.f32.partialorder %v829_v14, 0.0 }
 0x1c8   : > { %v795_v8 = vmul.f32 0.088388346, %v748_v25  ;;  %v3173_v12 = vsel %vm844_vm9, -1e+30, %v780_v5  ;;  %vm845_vm13 = vcmp.gt.f32.partialorder %v813_v15, 0.0  ;;  %v830_v21 = vld [vmem:[%s2992_s14 + $0xf8] sm:$0xff] }
 0x1c9   : > { %941 = vmax.xlane.f32.xlu1 %v3114_v20  ;;  %v3123_v29 = vpop.f32.mrb[14].mxu0  ;;  %v3170_v9 = vsel %vm860_vm8, -1e+30, %v796_v1  ;;  %v3181_v18 = vsel %vm843_vm11, -1e+30, %v779_v11  ;;  %vm862_vm14 = vcmp.gt.f32.partialorder %v830_v21, 0.0 }
 0x1ca   : > { %909 = vmax.xlane.f32.xlu0 %v3118_v24  ;;  %v3128_v33 = vpop.f32.mrb[14].mxu1  ;;  %v3130_v36 = vpop.f32.mrb[15].mxu0  ;;  %v3179_v17 = vsel %vm859_vm10, -1e+30, %v795_v8  ;;  %v814_v26 = vld [vmem:[%s2992_s14 + $0x78] sm:$0xff]  ;;  %v446_v38 = vld [vmem:[%s2988_s11 + $0x8] sm:$0xff] }
 0x1cb   : > { %v758_v39 = vpop.f32.mrb[15].mxu1  ;;  %v781_v19 = vmul.f32 0.088388346, %v3130_v36  ;;  %v798_v22 = vmul.f32 0.088388346, %v3128_v33  ;;  %vm846_vm15 = vcmp.gt.f32.partialorder %v814_v26, 0.0 }
 0x1cc   : > { %v797_v16 = vmul.f32 0.088388346, %v758_v39  ;;  %v782_v27 = vmul.f32 0.088388346, %v3123_v29  ;;  %v445_v36 = vld [vmem:[%s2988_s11] sm:$0xff]  ;;  %v447_v29 = vld [vmem:[%s2988_s11 + $0x10] sm:$0xff] }
 0x1cd   : > { %939 = vmax.xlane.f32.xlu1 %v3126_v32  ;;  %v3190_v25 = vsel %vm845_vm13, -1e+30, %v781_v19  ;;  %v3196_v31 = vsel %vm862_vm14, -1e+30, %v798_v22  ;;  %v2209_v39 = vpack.c.bf16 %v446_v38, %v445_v36  ;;  %v448_v40 = vld [vmem:[%s2988_s11 + $0x18] sm:$0xff]  ;;  %v461_v41 = vld [vmem:[%s2988_s11 + $0x80] sm:$0xff] }
 0x1ce   : > { %907 = vmax.xlane.f32.xlu0 %v3132_v37  ;;  %v3188_v23 = vsel %vm861_vm12, -1e+30, %v797_v16  ;;  %v3199_v33 = vsel %vm846_vm15, -1e+30, %v782_v27  ;;  %v462_v42 = vld [vmem:[%s2988_s11 + $0x88] sm:$0xff]  ;;  %v2213_v45 = vpack.c.bf16 %v448_v40, %v447_v29  ;;  %v449_v49 = vld [vmem:[%s2988_s11 + $0x20] sm:$0xff] }
 0x1cf   : > { %v2241_v47 = vpack.c.bf16 %v462_v42, %v461_v41  ;;  %v450_v50 = vld [vmem:[%s2988_s11 + $0x28] sm:$0xff]  ;;  %v463_v53 = vld [vmem:[%s2988_s11 + $0x90] sm:$0xff]  ;;  %2210 = vmatprep.subr.bf16.mxu0 %v2209_v39  ;;  %v464_v55 = vld [vmem:[%s2988_s11 + $0x98] sm:$0xff] }
 0x1d0   : > { %2212 = vmatpush3.bf16.msra.mxu0 %v2209_v39  ;;  %v2245_v56 = vpack.c.bf16 %v464_v55, %v463_v53  ;;  %v465_v58 = vld [vmem:[%s2988_s11 + $0xa0] sm:$0xff]  ;;  %v466_v60 = vld [vmem:[%s2988_s11 + $0xa8] sm:$0xff]  ;;  %v2217_v62 = vpack.c.bf16 %v450_v50, %v449_v49  ;;  %v451_v63 = vld [vmem:[%s2988_s11 + $0x30] sm:$0xff] }
 0x1d1   : > { %945 = vmax.xlane.f32.xlu1 %v3138_v43  ;;  %2242 = vmatprep.subr.bf16.mxu1 %v2241_v47  ;;  %v452_v1 = vld [vmem:[%s2988_s11 + $0x38] sm:$0xff]  ;;  %v2249_v5 = vpack.c.bf16 %v466_v60, %v465_v58 }
 0x1d2   : > { %913 = vmax.xlane.f32.xlu0 %v3140_v46  ;;  %2214 = vmatprep.subr.bf16.mxu0 %v2213_v45  ;;  %v2221_v6 = vpack.c.bf16 %v452_v1, %v451_v63 }
 0x1d3   : > { %2244 = vmatpush3.bf16.msra.mxu1 %v2241_v47 }
 0x1d4   : > { %2246 = vmatprep.subr.bf16.mxu1 %v2245_v56  ;;  %2216 = vmatpush3.bf16.msra.mxu0 %v2213_v45 }
 0x1d5   : > { %943 = vmax.xlane.f32.xlu1 %v3146_v51  ;;  %2218 = vmatprep.subr.bf16.mxu0 %v2217_v62 }
 0x1d6   : > { %911 = vmax.xlane.f32.xlu0 %v3148_v52 }
 0x1d7   : > { %2248 = vmatpush3.bf16.msra.mxu1 %v2245_v56 }
 0x1d8   : > { %2250 = vmatprep.subr.bf16.mxu1 %v2249_v5  ;;  %2220 = vmatpush3.bf16.msra.mxu0 %v2217_v62 }
 0x1d9   : > { %949 = vmax.xlane.f32.xlu1 %v3154_v59  ;;  %2222 = vmatprep.subr.bf16.mxu0 %v2221_v6 }
 0x1da   : > { %917 = vmax.xlane.f32.xlu0 %v3156_v61 }
 0x1db   : > { %2252 = vmatpush3.bf16.msra.mxu1 %v2249_v5 }
 0x1dc   : > { %2224 = vmatpush3.bf16.msra.mxu0 %v2221_v6 }
 0x1dd   : > { %947 = vmax.xlane.f32.xlu1 %v3162_v2 }
 0x1de   : > { %915 = vmax.xlane.f32.xlu0 %v3164_v3 }
 0x1e1   : > { %953 = vmax.xlane.f32.xlu1 %v3170_v9 }
 0x1e2   : > { %921 = vmax.xlane.f32.xlu0 %v3173_v12 }
 0x1e5   : > { %951 = vmax.xlane.f32.xlu1 %v3179_v17 }
 0x1e6   : > { %919 = vmax.xlane.f32.xlu0 %v3181_v18 }
 0x1e9   : > { %955 = vmax.xlane.f32.xlu1 %v3188_v23 }
 0x1ea   : > { %923 = vmax.xlane.f32.xlu0 %v3190_v25 }
 0x1ed   : > { %957 = vmax.xlane.f32.xlu1 %v3196_v31 }
 0x1ee   : > { %925 = vmax.xlane.f32.xlu0 %v3199_v33 }
 0x23e   : > { %v898_v7 = vpop.xlane.xlu1 %897 }
 0x23f   : > { %v960_v8 = vsub.f32 %v3066_v28, %v898_v7  ;;  %v896_v11 = vpop.xlane.xlu0 %895 }
 0x240   : > { %v959_v14 = vsub.f32 %v3070_v30, %v896_v11 }
 0x241   : > { %v993_v15 = vmul.f32 1.442695, %v960_v8 }
 0x242   : > { %v991_v16 = vmul.f32 1.442695, %v959_v14  ;;  %v930_v19 = vpop.xlane.xlu1 %929 }
 0x243   : > { %2343 = vpow2.f32 %v993_v15  ;;  %v976_v21 = vsub.f32 %v3074_v34, %v930_v19  ;;  %v928_v22 = vpop.xlane.xlu0 %927 }
 0x244   : > { %v975_v26 = vsub.f32 %v3076_v35, %v928_v22  ;;  %2345 = vpow2.f32 %v991_v16  ;;  %v454_v22 = vld [vmem:[%s2988_s11 + $0x48] sm:$0xff] }
 0x245   : > { %v1025_v27 = vmul.f32 1.442695, %v976_v21  ;;  %v453_v21 = vld [vmem:[%s2988_s11 + $0x40] sm:$0xff] }
 0x246   : > { %v934_v36 = vpop.xlane.xlu1 %933  ;;  %v1023_v38 = vmul.f32 1.442695, %v975_v26  ;;  %v467_v26 = vld [vmem:[%s2988_s11 + $0xb0] sm:$0xff] }
 0x247   : > { %2347 = vpow2.f32 %v1025_v27  ;;  %v978_v29 = vsub.f32 %v3082_v44, %v934_v36  ;;  %v902_v28 = vpop.xlane.xlu0 %901  ;;  %v2225_v27 = vpack.c.bf16 %v454_v22, %v453_v21  ;;  %v468_v36 = vld [vmem:[%s2988_s11 + $0xb8] sm:$0xff]  ;;  %v473_v21 = vld [vmem:[%s2988_s11 + $0xe0] sm:$0xff] }
 0x248   : > { %v962_v39 = vsub.f32 %v3084_v48, %v902_v28  ;;  %2349 = vpow2.f32 %v1023_v38 }
 0x249   : > { %v1029_v41 = vmul.f32 1.442695, %v978_v29  ;;  %v2253_v29 = vpack.c.bf16 %v468_v36, %v467_v26  ;;  %2226 = vmatprep.subr.bf16.mxu0 %v2225_v27 }
 0x24a   : > { %v997_v30 = vmul.f32 1.442695, %v962_v39  ;;  %v932_v40 = vpop.xlane.xlu1 %931  ;;  %2228 = vmatpush3.bf16.msra.mxu0 %v2225_v27 }
 0x24b   : > { %v977_v42 = vsub.f32 %v3090_v54, %v932_v40  ;;  %v900_v34 = vpop.xlane.xlu0 %899  ;;  %2254 = vmatprep.subr.bf16.mxu1 %v2253_v29 }
 0x24c   : > { %2351 = vpow2.f32 %v997_v30  ;;  %v961_v35 = vsub.f32 %v3092_v57, %v900_v34  ;;  %2256 = vmatpush3.bf16.msra.mxu1 %v2253_v29  ;;  %v456_v34 = vld [vmem:[%s2988_s11 + $0x58] sm:$0xff] }
 0x24d   : > { %v3224_v45 = vpop.eup %2343  ;;  %2353 = vpow2.f32 %v1029_v41  ;;  %v1027_v44 = vmul.f32 1.442695, %v977_v42  ;;  %v455_v42 = vld [vmem:[%s2988_s11 + $0x50] sm:$0xff] }
 0x24e   : > { %v995_v47 = vmul.f32 1.442695, %v961_v35  ;;  %v938_v49 = vpop.xlane.xlu1 %937  ;;  %1057 = vadd.xlane.f32.xlu0 %v3224_v45  ;;  %v3228_v53 = vpop.eup %2345  ;;  %v469_v35 = vld [vmem:[%s2988_s11 + $0xc0] sm:$0xff] }
 0x24f   : > { %v980_v48 = vsub.f32 %v3098_v0, %v938_v49  ;;  %v906_v50 = vpop.xlane.xlu0 %905  ;;  %v2229_v49 = vpack.c.bf16 %v456_v34, %v455_v42 }
 0x250   : > { %2355 = vpow2.f32 %v995_v47  ;;  %v964_v54 = vsub.f32 %v3100_v4, %v906_v50 }
 0x251   : > { %v3231_v55 = vpop.eup %2347  ;;  %2357 = vpow2.f32 %v1027_v44  ;;  %v1033_v58 = vmul.f32 1.442695, %v980_v48  ;;  %v470_v44 = vld [vmem:[%s2988_s11 + $0xc8] sm:$0xff]  ;;  %2230 = vmatprep.subr.bf16.mxu0 %v2229_v49 }
 0x252   : > { %v1001_v56 = vmul.f32 1.442695, %v964_v54  ;;  %1089 = vadd.xlane.f32.xlu1 %v3231_v55  ;;  %v936_v57 = vpop.xlane.xlu1 %935  ;;  %1055 = vadd.xlane.f32.xlu0 %v3228_v53  ;;  %v3237_v63 = vpop.eup %2349  ;;  %v2257_v54 = vpack.c.bf16 %v470_v44, %v469_v35 }
 0x253   : > { %v979_v60 = vsub.f32 %v3106_v10, %v936_v57  ;;  %v904_v62 = vpop.xlane.xlu0 %903  ;;  %2232 = vmatpush3.bf16.msra.mxu0 %v2229_v49 }
 0x254   : > { %2359 = vpow2.f32 %v1001_v56  ;;  %v963_v0 = vsub.f32 %v3108_v13, %v904_v62  ;;  %2258 = vmatprep.subr.bf16.mxu1 %v2257_v54  ;;  %v458_v62 = vld [vmem:[%s2988_s11 + $0x68] sm:$0xff] }
 0x255   : > { %2361 = vpow2.f32 %v1033_v58  ;;  %v1031_v6 = vmul.f32 1.442695, %v979_v60  ;;  %v457_v60 = vld [vmem:[%s2988_s11 + $0x60] sm:$0xff]  ;;  %2260 = vmatpush3.bf16.msra.mxu1 %v2257_v54 }
 0x256   : > { %v3239_v1 = vpop.eup %2351  ;;  %v999_v4 = vmul.f32 1.442695, %v963_v0  ;;  %v942_v5 = vpop.xlane.xlu1 %941  ;;  %1087 = vadd.xlane.f32.xlu1 %v3237_v63  ;;  %v471_v0 = vld [vmem:[%s2988_s11 + $0xd0] sm:$0xff] }
 0x257   : > { %v982_v7 = vsub.f32 %v3114_v20, %v942_v5  ;;  %v910_v8 = vpop.xlane.xlu0 %909  ;;  %1061 = vadd.xlane.f32.xlu0 %v3239_v1  ;;  %v3245_v13 = vpop.eup %2353  ;;  %v2233_v5 = vpack.c.bf16 %v458_v62, %v457_v60 }
 0x258   : > { %2363 = vpow2.f32 %v999_v4  ;;  %v966_v10 = vsub.f32 %v3118_v24, %v910_v8 }
 0x259   : > { %2365 = vpow2.f32 %v1031_v6  ;;  %v1037_v16 = vmul.f32 1.442695, %v982_v7  ;;  %v472_v6 = vld [vmem:[%s2988_s11 + $0xd8] sm:$0xff]  ;;  %2234 = vmatprep.subr.bf16.mxu0 %v2233_v5 }
 0x25a   : > { %v3247_v11 = vpop.eup %2355  ;;  %v1005_v14 = vmul.f32 1.442695, %v966_v10  ;;  %v940_v15 = vpop.xlane.xlu1 %939  ;;  %1093 = vadd.xlane.f32.xlu1 %v3245_v13  ;;  %2236 = vmatpush3.bf16.msra.mxu0 %v2233_v5 }
 0x25b   : > { %v981_v20 = vsub.f32 %v3126_v32, %v940_v15  ;;  %v908_v19 = vpop.xlane.xlu0 %907  ;;  %1059 = vadd.xlane.f32.xlu0 %v3247_v11  ;;  %v3257_v38 = vpop.eup %2357 }
 0x25c   : > { %2367 = vpow2.f32 %v1005_v14  ;;  %v965_v24 = vsub.f32 %v3132_v37, %v908_v19  ;;  %v460_v19 = vld [vmem:[%s2988_s11 + $0x78] sm:$0xff] }
 0x25d   : > { %2369 = vpow2.f32 %v1037_v16  ;;  %v1035_v30 = vmul.f32 1.442695, %v981_v20  ;;  %v459_v20 = vld [vmem:[%s2988_s11 + $0x70] sm:$0xff] }
 0x25e   : > { %v3259_v28 = vpop.eup %2359  ;;  %v1003_v39 = vmul.f32 1.442695, %v965_v24  ;;  %v946_v32 = vpop.xlane.xlu1 %945  ;;  %1091 = vadd.xlane.f32.xlu1 %v3257_v38  ;;  %v2237_v26 = vpack.c.bf16 %v460_v19, %v459_v20  ;;  %v474_v24 = vld [vmem:[%s2988_s11 + $0xe8] sm:$0xff] }
 0x25f   : > { %v984_v37 = vsub.f32 %v3138_v43, %v946_v32  ;;  %v914_v40 = vpop.xlane.xlu0 %913  ;;  %1065 = vadd.xlane.f32.xlu0 %v3259_v28  ;;  %v3268_v47 = vpop.eup %2361  ;;  %v2265_v29 = vpack.c.bf16 %v474_v24, %v473_v21 }
 0x260   : > { %2371 = vpow2.f32 %v1003_v39  ;;  %v968_v41 = vsub.f32 %v3140_v46, %v914_v40  ;;  %2238 = vmatprep.subr.bf16.mxu0 %v2237_v26  ;;  %v476_v40 = vld [vmem:[%s2988_s11 + $0xf8] sm:$0xff] }
 0x261   : > { %2373 = vpow2.f32 %v1035_v30  ;;  %v1041_v46 = vmul.f32 1.442695, %v984_v37  ;;  %2240 = vmatpush3.bf16.msra.mxu0 %v2237_v26  ;;  %v475_v37 = vld [vmem:[%s2988_s11 + $0xf0] sm:$0xff] }
 0x262   : > { %v3271_v48 = vpop.eup %2363  ;;  %v1009_v43 = vmul.f32 1.442695, %v968_v41  ;;  %v944_v50 = vpop.xlane.xlu1 %943  ;;  %1097 = vadd.xlane.f32.xlu1 %v3268_v47  ;;  %v2269_v42 = vpack.c.bf16 %v476_v40, %v475_v37 }
 0x263   : > { %v983_v56 = vsub.f32 %v3146_v51, %v944_v50  ;;  %v912_v57 = vpop.xlane.xlu0 %911  ;;  %1063 = vadd.xlane.f32.xlu0 %v3271_v48  ;;  %v3280_v4 = vpop.eup %2365 }
 0x264   : > { %2375 = vpow2.f32 %v1009_v43  ;;  %v967_v58 = vsub.f32 %v3148_v52, %v912_v57  ;;  %v2261_v52 = vpack.c.bf16 %v472_v6, %v471_v0 }
 0x265   : > { %2377 = vpow2.f32 %v1041_v46  ;;  %v1039_v10 = vmul.f32 1.442695, %v983_v56 }
 0x266   : > { %v3283_v7 = vpop.eup %2367  ;;  %v1007_v51 = vmul.f32 1.442695, %v967_v58  ;;  %v950_v8 = vpop.xlane.xlu1 %949  ;;  %1095 = vadd.xlane.f32.xlu1 %v3280_v4  ;;  %2262 = vmatprep.subr.bf16.mxu1 %v2261_v52 }
 0x267   : > { %v986_v14 = vsub.f32 %v3154_v59, %v950_v8  ;;  %v918_v15 = vpop.xlane.xlu0 %917  ;;  %1069 = vadd.xlane.f32.xlu0 %v3283_v7  ;;  %v3292_v22 = vpop.eup %2369  ;;  %2264 = vmatpush3.bf16.msra.mxu1 %v2261_v52 }
 0x268   : > { %2379 = vpow2.f32 %v1007_v51  ;;  %v970_v16 = vsub.f32 %v3156_v61, %v918_v15  ;;  %2266 = vmatprep.subr.bf16.mxu1 %v2265_v29 }
 0x269   : > { %2381 = vpow2.f32 %v1039_v10  ;;  %v1045_v61 = vmul.f32 1.442695, %v986_v14 }
 0x26a   : > { %v3295_v27 = vpop.eup %2371  ;;  %v1013_v59 = vmul.f32 1.442695, %v970_v16  ;;  %v948_v36 = vpop.xlane.xlu1 %947  ;;  %1101 = vadd.xlane.f32.xlu1 %v3292_v22 }
 0x26b   : > { %v985_v39 = vsub.f32 %v3162_v2, %v948_v36  ;;  %v916_v32 = vpop.xlane.xlu0 %915  ;;  %1067 = vadd.xlane.f32.xlu0 %v3295_v27  ;;  %v3303_v41 = vpop.eup %2373  ;;  %2268 = vmatpush3.bf16.msra.mxu1 %v2265_v29 }
 0x26c   : > { %2383 = vpow2.f32 %v1013_v59  ;;  %v969_v30 = vsub.f32 %v3164_v3, %v916_v32  ;;  %2270 = vmatprep.subr.bf16.mxu1 %v2269_v42 }
 0x26d   : > { %2385 = vpow2.f32 %v1045_v61  ;;  %v1043_v2 = vmul.f32 1.442695, %v985_v39 }
 0x26e   : > { %v3305_v34 = vpop.eup %2375  ;;  %v1011_v35 = vmul.f32 1.442695, %v969_v30  ;;  %v954_v49 = vpop.xlane.xlu1 %953  ;;  %1099 = vadd.xlane.f32.xlu1 %v3303_v41 }
 0x26f   : > { %v988_v44 = vsub.f32 %v3170_v9, %v954_v49  ;;  %v922_v43 = vpop.xlane.xlu0 %921  ;;  %1073 = vadd.xlane.f32.xlu0 %v3305_v34  ;;  %v3311_v50 = vpop.eup %2377  ;;  %2272 = vmatpush3.bf16.msra.mxu1 %v2269_v42 }
 0x270   : > { %2387 = vpow2.f32 %v1011_v35  ;;  %v972_v3 = vsub.f32 %v3173_v12, %v922_v43 }
 0x271   : > { %2389 = vpow2.f32 %v1043_v2  ;;  %v1049_v57 = vmul.f32 1.442695, %v988_v44 }
 0x272   : > { %v3313_v54 = vpop.eup %2379  ;;  %v1017_v46 = vmul.f32 1.442695, %v972_v3  ;;  %v952_v56 = vpop.xlane.xlu1 %951  ;;  %1105 = vadd.xlane.f32.xlu1 %v3311_v50 }
 0x273   : > { %v987_v9 = vsub.f32 %v3179_v17, %v952_v56  ;;  %v920_v58 = vpop.xlane.xlu0 %919  ;;  %1071 = vadd.xlane.f32.xlu0 %v3313_v54  ;;  %v3319_v12 = vpop.eup %2381 }
 0x274   : > { %2391 = vpow2.f32 %v1017_v46  ;;  %v971_v60 = vsub.f32 %v3181_v18, %v920_v58 }
 0x275   : > { %2393 = vpow2.f32 %v1049_v57  ;;  %v1047_v6 = vmul.f32 1.442695, %v987_v9 }
 0x276   : > { %v3321_v62 = vpop.eup %2383  ;;  %v1015_v0 = vmul.f32 1.442695, %v971_v60  ;;  %v956_v5 = vpop.xlane.xlu1 %955  ;;  %1103 = vadd.xlane.f32.xlu1 %v3319_v12 }
 0x277   : > { %v989_v51 = vsub.f32 %v3188_v23, %v956_v5  ;;  %1077 = vadd.xlane.f32.xlu0 %v3321_v62  ;;  %v924_v17 = vpop.xlane.xlu0 %923  ;;  %v3327_v52 = vpop.eup %2385 }
 0x278   : > { %2395 = vpow2.f32 %v1015_v0  ;;  %v973_v8 = vsub.f32 %v3190_v25, %v924_v17 }
 0x279   : > { %2397 = vpow2.f32 %v1047_v6  ;;  %v1051_v15 = vmul.f32 1.442695, %v989_v51 }
 0x27a   : > { %v3329_v18 = vpop.eup %2387  ;;  %v1019_v10 = vmul.f32 1.442695, %v973_v8  ;;  %v958_v14 = vpop.xlane.xlu1 %957  ;;  %1109 = vadd.xlane.f32.xlu1 %v3327_v52 }
 0x27b   : > { %v990_v16 = vsub.f32 %v3196_v31, %v958_v14  ;;  %1075 = vadd.xlane.f32.xlu0 %v3329_v18  ;;  %v926_v23 = vpop.xlane.xlu0 %925  ;;  %v3335_v19 = vpop.eup %2389 }
 0x27c   : > { %2399 = vpow2.f32 %v1019_v10  ;;  %v974_v20 = vsub.f32 %v3199_v33, %v926_v23 }
 0x27d   : > { %2401 = vpow2.f32 %v1051_v15  ;;  %v1053_v26 = vmul.f32 1.442695, %v990_v16 }
 0x27e   : > { %v3337_v25 = vpop.eup %2391  ;;  %v1021_v21 = vmul.f32 1.442695, %v974_v20  ;;  %1107 = vadd.xlane.f32.xlu1 %v3335_v19 }
 0x27f   : > { %1081 = vadd.xlane.f32.xlu0 %v3337_v25  ;;  %v3341_v24 = vpop.eup %2393 }
 0x280   : > { %2403 = vpow2.f32 %v1021_v21 }
 0x281   : > { %2405 = vpow2.f32 %v1053_v26 }
 0x282   : > { %v3343_v31 = vpop.eup %2395  ;;  %1113 = vadd.xlane.f32.xlu1 %v3341_v24 }
 0x283   : > { %1079 = vadd.xlane.f32.xlu0 %v3343_v31  ;;  %v3347_v33 = vpop.eup %2397 }
 0x286   : > { %v3349_v59 = vpop.eup %2399  ;;  %1111 = vadd.xlane.f32.xlu1 %v3347_v33 }
 0x287   : > { %1083 = vadd.xlane.f32.xlu0 %v3349_v59  ;;  %v3353_v36 = vpop.eup %2401 }
 0x28a   : > { %v3355_v29 = vpop.eup %2403  ;;  %1115 = vadd.xlane.f32.xlu1 %v3353_v36 }
 0x28b   : > { %1085 = vadd.xlane.f32.xlu0 %v3355_v29  ;;  %v3359_v61 = vpop.eup %2405 }
 0x28e   : > { %1117 = vadd.xlane.f32.xlu1 %v3359_v61 }
 0x2db   : > { %v1058_v39 = vpop.xlane.xlu0 %1057 }
 0x2dc   : > { %2407 = vrcp.f32 %v1058_v39 }
 0x2df   : > { %v1090_v32 = vpop.xlane.xlu1 %1089  ;;  %v1056_v30 = vpop.xlane.xlu0 %1055 }
 0x2e0   : > { %2409 = vrcp.f32 %v1090_v32 }
 0x2e1   : > { %2411 = vrcp.f32 %v1056_v30 }
 0x2e3   : > { %v1088_v37 = vpop.xlane.xlu1 %1087 }
 0x2e4   : > { %2413 = vrcp.f32 %v1088_v37  ;;  %v1062_v40 = vpop.xlane.xlu0 %1061 }
 0x2e5   : > { %2415 = vrcp.f32 %v1062_v40 }
 0x2e6   : > { %v2408_v42 = vpop.eup %2407 }
 0x2e7   : > { %v1152_v35 = vmul.f32 %v2408_v42, %v3224_v45  ;;  %v1094_v49 = vpop.xlane.xlu1 %1093 }
 0x2e8   : > { %2417 = vrcp.f32 %v1094_v49  ;;  %v1060_v2 = vpop.xlane.xlu0 %1059 }
 0x2e9   : > { %1184 = vst [vmem:[%s3364_s28 + $0x8] sm:$0xff] %v1152_v35  ;;  %2419 = vrcp.f32 %v1060_v2 }
 0x2ea   : > { %v2410_v44 = vpop.eup %2409 }
 0x2eb   : > { %v2412_v43 = vpop.eup %2411  ;;  %v1168_v3 = vmul.f32 %v2410_v44, %v3231_v55  ;;  %v1092_v46 = vpop.xlane.xlu1 %1091 }
 0x2ec   : > { %2421 = vrcp.f32 %v1092_v46  ;;  %v1066_v56 = vpop.xlane.xlu0 %1065  ;;  %v1151_v45 = vmul.f32 %v2412_v43, %v3228_v53 }
 0x2ed   : > { %1200 = vst [vmem:[%s3364_s28 + $0x88] sm:$0xff] %v1168_v3  ;;  %2423 = vrcp.f32 %v1066_v56 }
 0x2ee   : > { %v2414_v57 = vpop.eup %2413  ;;  %1183 = vst [vmem:[%s3364_s28] sm:$0xff] %v1151_v45  ;;  %2065 = vmatprep.mubr.f32.mxu0 %v1151_v45 }
 0x2ef   : > { %v2416_v9 = vpop.eup %2415  ;;  %2066 = vmatmul.mubr.f32.vlgmr.msra.gmra.mrb[16].mxu0 %v1152_v35  ;;  %v1098_v58 = vpop.xlane.xlu1 %1097  ;;  %v1167_v60 = vmul.f32 %v2414_v57, %v3237_v63 }
 0x2f0   : > { %2425 = vrcp.f32 %v1098_v58  ;;  %v1064_v55 = vpop.xlane.xlu0 %1063  ;;  %v1154_v0 = vmul.f32 %v2416_v9, %v3239_v1 }
 0x2f1   : > { %2427 = vrcp.f32 %v1064_v55  ;;  %1199 = vst [vmem:[%s3364_s28 + $0x80] sm:$0xff] %v1167_v60  ;;  %2121 = vmatprep.mubr.f32.mxu1 %v1167_v60 }
 0x2f2   : > { %v2418_v53 = vpop.eup %2417  ;;  %2122 = vmatmul.mubr.f32.vlgmr.msra.gmra.mrb[16].mxu1 %v1168_v3  ;;  %1186 = vst [vmem:[%s3364_s28 + $0x18] sm:$0xff] %v1154_v0 }
 0x2f3   : > { %v2420_v5 = vpop.eup %2419  ;;  %v1096_v6 = vpop.xlane.xlu1 %1095  ;;  %v1170_v51 = vmul.f32 %v2418_v53, %v3245_v13 }
 0x2f4   : > { %2429 = vrcp.f32 %v1096_v6  ;;  %v1070_v17 = vpop.xlane.xlu0 %1069  ;;  %v1153_v63 = vmul.f32 %v2420_v5, %v3247_v11 }
 0x2f5   : > { %2431 = vrcp.f32 %v1070_v17  ;;  %1202 = vst [vmem:[%s3364_s28 + $0x98] sm:$0xff] %v1170_v51 }
 0x2f6   : > { %v2422_v1 = vpop.eup %2421  ;;  %1185 = vst [vmem:[%s3364_s28 + $0x10] sm:$0xff] %v1153_v63  ;;  %2068 = vmatprep.mubr.f32.mxu0 %v1153_v63 }
 0x2f7   : > { %v2424_v8 = vpop.eup %2423  ;;  %v1102_v10 = vpop.xlane.xlu1 %1101  ;;  %2069 = vmatmul.mubr.f32.gmra.mrb[18].mxu0 %v1154_v0  ;;  %v1169_v14 = vmul.f32 %v2422_v1, %v3257_v38 }
 0x2f8   : > { %2433 = vrcp.f32 %v1102_v10  ;;  %v1068_v15 = vpop.xlane.xlu0 %1067  ;;  %v1156_v13 = vmul.f32 %v2424_v8, %v3259_v28 }
 0x2f9   : > { %2435 = vrcp.f32 %v1068_v15  ;;  %1201 = vst [vmem:[%s3364_s28 + $0x90] sm:$0xff] %v1169_v14  ;;  %2124 = vmatprep.mubr.f32.mxu1 %v1169_v14 }
 0x2fa   : > { %v2426_v11 = vpop.eup %2425  ;;  %2125 = vmatmul.mubr.f32.gmra.mrb[18].mxu1 %v1170_v51  ;;  %1188 = vst [vmem:[%s3364_s28 + $0x28] sm:$0xff] %v1156_v13 }
 0x2fb   : > { %v2428_v16 = vpop.eup %2427  ;;  %v1100_v23 = vpop.xlane.xlu1 %1099  ;;  %v1172_v20 = vmul.f32 %v2426_v11, %v3268_v47 }
 0x2fc   : > { %2437 = vrcp.f32 %v1100_v23  ;;  %v1074_v21 = vpop.xlane.xlu0 %1073  ;;  %v1155_v38 = vmul.f32 %v2428_v16, %v3271_v48 }
 0x2fd   : > { %2439 = vrcp.f32 %v1074_v21  ;;  %1204 = vst [vmem:[%s3364_s28 + $0xa8] sm:$0xff] %v1172_v20 }
 0x2fe   : > { %v2430_v28 = vpop.eup %2429  ;;  %1187 = vst [vmem:[%s3364_s28 + $0x20] sm:$0xff] %v1155_v38  ;;  %2071 = vmatprep.mubr.f32.mxu0 %v1155_v38 }
 0x2ff   : > { %v2432_v26 = vpop.eup %2431  ;;  %v1106_v39 = vpop.xlane.xlu1 %1105  ;;  %2072 = vmatmul.mubr.f32.gmra.mrb[20].mxu0 %v1156_v13  ;;  %v1171_v32 = vmul.f32 %v2430_v28, %v3280_v4 }
 0x300   : > { %2441 = vrcp.f32 %v1106_v39  ;;  %v1072_v30 = vpop.xlane.xlu0 %1071  ;;  %v1158_v47 = vmul.f32 %v2432_v26, %v3283_v7 }
 0x301   : > { %2443 = vrcp.f32 %v1072_v30  ;;  %1203 = vst [vmem:[%s3364_s28 + $0xa0] sm:$0xff] %v1171_v32  ;;  %2127 = vmatprep.mubr.f32.mxu1 %v1171_v32 }
 0x302   : > { %v2434_v48 = vpop.eup %2433  ;;  %2128 = vmatmul.mubr.f32.gmra.mrb[20].mxu1 %v1172_v20  ;;  %1190 = vst [vmem:[%s3364_s28 + $0x38] sm:$0xff] %v1158_v47 }
 0x303   : > { %v2436_v37 = vpop.eup %2435  ;;  %v1104_v40 = vpop.xlane.xlu1 %1103  ;;  %v1174_v42 = vmul.f32 %v2434_v48, %v3292_v22 }
 0x304   : > { %2445 = vrcp.f32 %v1104_v40  ;;  %v1078_v35 = vpop.xlane.xlu0 %1077  ;;  %v1157_v4 = vmul.f32 %v2436_v37, %v3295_v27 }
 0x305   : > { %2447 = vrcp.f32 %v1078_v35  ;;  %1206 = vst [vmem:[%s3364_s28 + $0xb8] sm:$0xff] %v1174_v42 }
 0x306   : > { %v2438_v7 = vpop.eup %2437  ;;  %1189 = vst [vmem:[%s3364_s28 + $0x30] sm:$0xff] %v1157_v4  ;;  %2074 = vmatprep.mubr.f32.mxu0 %v1157_v4 }
 0x307   : > { %v2440_v49 = vpop.eup %2439  ;;  %v1110_v2 = vpop.xlane.xlu1 %1109  ;;  %2075 = vmatmul.mubr.f32.gmra.mrb[22].mxu0 %v1158_v47  ;;  %v1173_v44 = vmul.f32 %v2438_v7, %v3303_v41 }
 0x308   : > { %2449 = vrcp.f32 %v1110_v2  ;;  %v1076_v43 = vpop.xlane.xlu0 %1075  ;;  %v1160_v22 = vmul.f32 %v2440_v49, %v3305_v34 }
 0x309   : > { %2451 = vrcp.f32 %v1076_v43  ;;  %1205 = vst [vmem:[%s3364_s28 + $0xb0] sm:$0xff] %v1173_v44  ;;  %2130 = vmatprep.mubr.f32.mxu1 %v1173_v44 }
 0x30a   : > { %v2442_v27 = vpop.eup %2441  ;;  %2131 = vmatmul.mubr.f32.gmra.mrb[22].mxu1 %v1174_v42  ;;  %1192 = vst [vmem:[%s3364_s28 + $0x48] sm:$0xff] %v1160_v22 }
 0x30b   : > { %v2444_v3 = vpop.eup %2443  ;;  %v1108_v46 = vpop.xlane.xlu1 %1107  ;;  %v1176_v56 = vmul.f32 %v2442_v27, %v3311_v50 }
 0x30c   : > { %2453 = vrcp.f32 %v1108_v46  ;;  %v1082_v45 = vpop.xlane.xlu0 %1081  ;;  %v1159_v41 = vmul.f32 %v2444_v3, %v3313_v54 }
 0x30d   : > { %2455 = vrcp.f32 %v1082_v45  ;;  %1208 = vst [vmem:[%s3364_s28 + $0xc8] sm:$0xff] %v1176_v56 }
 0x30e   : > { %v2446_v34 = vpop.eup %2445  ;;  %1191 = vst [vmem:[%s3364_s28 + $0x40] sm:$0xff] %v1159_v41  ;;  %2077 = vmatprep.mubr.f32.mxu0 %v1159_v41 }
 0x30f   : > { %v2448_v57 = vpop.eup %2447  ;;  %v1114_v9 = vpop.xlane.xlu1 %1113  ;;  %2078 = vmatmul.mubr.f32.gmra.mrb[24].mxu0 %v1160_v22  ;;  %v1175_v58 = vmul.f32 %v2446_v34, %v3319_v12 }
 0x310   : > { %2457 = vrcp.f32 %v1114_v9  ;;  %v1080_v60 = vpop.xlane.xlu0 %1079  ;;  %v1162_v50 = vmul.f32 %v2448_v57, %v3321_v62 }
 0x311   : > { %2459 = vrcp.f32 %v1080_v60  ;;  %1207 = vst [vmem:[%s3364_s28 + $0xc0] sm:$0xff] %v1175_v58  ;;  %2133 = vmatprep.mubr.f32.mxu1 %v1175_v58 }
 0x312   : > { %v2450_v54 = vpop.eup %2449  ;;  %2134 = vmatmul.mubr.f32.gmra.mrb[24].mxu1 %v1176_v56  ;;  %1194 = vst [vmem:[%s3364_s28 + $0x58] sm:$0xff] %v1162_v50 }
 0x313   : > { %v2452_v55 = vpop.eup %2451  ;;  %v1112_v0 = vpop.xlane.xlu1 %1111  ;;  %v1178_v53 = vmul.f32 %v2450_v54, %v3327_v52 }
 0x314   : > { %2461 = vrcp.f32 %v1112_v0  ;;  %v1084_v5 = vpop.xlane.xlu0 %1083  ;;  %v1161_v12 = vmul.f32 %v2452_v55, %v3329_v18 }
 0x315   : > { %2463 = vrcp.f32 %v1084_v5  ;;  %1210 = vst [vmem:[%s3364_s28 + $0xd8] sm:$0xff] %v1178_v53 }
 0x316   : > { %v2454_v62 = vpop.eup %2453  ;;  %1193 = vst [vmem:[%s3364_s28 + $0x50] sm:$0xff] %v1161_v12  ;;  %2080 = vmatprep.mubr.f32.mxu0 %v1161_v12 }
 0x317   : > { %v2456_v6 = vpop.eup %2455  ;;  %v1116_v51 = vpop.xlane.xlu1 %1115  ;;  %2081 = vmatmul.mubr.f32.gmra.mrb[26].mxu0 %v1162_v50  ;;  %v1177_v17 = vmul.f32 %v2454_v62, %v3335_v19 }
 0x318   : > { %2465 = vrcp.f32 %v1116_v51  ;;  %v1086_v52 = vpop.xlane.xlu0 %1085  ;;  %v1164_v63 = vmul.f32 %v2456_v6, %v3337_v25 }
 0x319   : > { %2467 = vrcp.f32 %v1086_v52  ;;  %1209 = vst [vmem:[%s3364_s28 + $0xd0] sm:$0xff] %v1177_v17  ;;  %2136 = vmatprep.mubr.f32.mxu1 %v1177_v17 }
 0x31a   : > { %v2458_v18 = vpop.eup %2457  ;;  %2137 = vmatmul.mubr.f32.gmra.mrb[26].mxu1 %v1178_v53  ;;  %1196 = vst [vmem:[%s3364_s28 + $0x68] sm:$0xff] %v1164_v63 }
 0x31b   : > { %v2460_v1 = vpop.eup %2459  ;;  %v1118_v8 = vpop.xlane.xlu1 %1117  ;;  %v1180_v10 = vmul.f32 %v2458_v18, %v3341_v24 }
 0x31c   : > { %2469 = vrcp.f32 %v1118_v8  ;;  %v1163_v19 = vmul.f32 %v2460_v1, %v3343_v31 }
 0x31d   : > { %1212 = vst [vmem:[%s3364_s28 + $0xe8] sm:$0xff] %v1180_v10 }
 0x31e   : > { %v2462_v14 = vpop.eup %2461  ;;  %1195 = vst [vmem:[%s3364_s28 + $0x60] sm:$0xff] %v1163_v19  ;;  %2083 = vmatprep.mubr.f32.mxu0 %v1163_v19 }
 0x31f   : > { %v2464_v25 = vpop.eup %2463  ;;  %2084 = vmatmul.mubr.f32.gmra.mrb[28].mxu0 %v1164_v63  ;;  %v1179_v15 = vmul.f32 %v2462_v14, %v3347_v33 }
 0x320   : > { %v1165_v13 = vmul.f32 %v2464_v25, %v3349_v59 }
 0x321   : > { %1211 = vst [vmem:[%s3364_s28 + $0xe0] sm:$0xff] %v1179_v15  ;;  %2139 = vmatprep.mubr.f32.mxu1 %v1179_v15 }
 0x322   : > { %v2466_v24 = vpop.eup %2465  ;;  %1197 = vst [vmem:[%s3364_s28 + $0x70] sm:$0xff] %v1165_v13  ;;  %2086 = vmatprep.mubr.f32.mxu0 %v1165_v13  ;;  %2140 = vmatmul.mubr.f32.gmra.mrb[28].mxu1 %v1180_v10 }
 0x323   : > { %v2468_v31 = vpop.eup %2467  ;;  %v1181_v11 = vmul.f32 %v2466_v24, %v3353_v36 }
 0x324   : > { %v1166_v16 = vmul.f32 %v2468_v31, %v3355_v29 }
 0x325   : > { %1213 = vst [vmem:[%s3364_s28 + $0xf0] sm:$0xff] %v1181_v11  ;;  %2142 = vmatprep.mubr.f32.mxu1 %v1181_v11 }
 0x326   : > { %v2470_v33 = vpop.eup %2469  ;;  %1198 = vst [vmem:[%s3364_s28 + $0x78] sm:$0xff] %v1166_v16  ;;  %2087 = vmatmul.mubr.f32.gmra.mrb[30].mxu0 %v1166_v16 }
 0x327   : > { %v1182_v59 = vmul.f32 %v2470_v33, %v3359_v61 }
 0x329   : > { %1214 = vst [vmem:[%s3364_s28 + $0xf8] sm:$0xff] %v1182_v59  ;;  %2143 = vmatmul.mubr.f32.gmra.mrb[30].mxu1 %v1182_v59 }
 0x32a   : > { %2604 = shalt.err (!%p2601_p5)
}
 0x32b   : > { %s2605_s16 = scalar_lea.hbm %s3435_s7, 4096  ;;  %s2609_s17 = scalar_lea.hbm %s3562_s5, 8192 }
 0x32c   : > { %p2606_p1 = scmp.ne.s32.totalorder %s3435_s7, %s2605_s16  ;;  %p2610_p12 = scmp.lt.u32.totalorder %s3435_s7, %s3562_s5 }
 0x32d   : > { %p2611_p2 = scmp.lt.u32.totalorder %s2609_s17, %s2605_s16  ;;  %p2613_p13 = scmp.lt.u32.totalorder %s2605_s16, %s3435_s7 }
 0x32e   : > { %p2607_p7 = pnand %p2606_p1, %p3587_p0 }
 0x32f   : > { %p2612_p6 = por %p2611_p2, %p2610_p12 }
 0x330   : > { %p2608_p9 = pneg %p2607_p7 }
 0x331   : > { %p2614_p8 = por %p2613_p13, %p2612_p6 }
 0x333   : > { %p2615_p10 = pnand %p2614_p8, %p2608_p9 }
 0x335   : > { %2618 = shalt.err (!%p2615_p10)
}
 0x336   : > { %s2706_s14 = smov 128   ;;  %s2707_s28 = smov 8  }
 0x337   : > { %2282 = dma.vmem_to_hbm [thread:$0]  (%p3587_p0), %s3438_s1, 4096, %s3435_s7, %s1543_s8, %s2706_s14, %s2706_s14, %s2707_s28  }
 0x338   : > { %s3468_s12 = scalar_lea.vmem [#allocation10], %s2969_s10  ;;  %s3506_s1 = scalar_lea.hbm %s3561_s4, %s1790_s20 }
 0x339   : > { %s1557_s10 = sshll.u32 %s3468_s12, 4  ;;  %s1538_s8 = scalar_lea.sflag [#allocation4], %s2966_s23  ;;  %s3508_s10 = int_to_ptr.vmem [resolvable:$true] %s1557_s10 }
 0x33a   : > { %s2619_s0 = scalar_lea.vmem %s3508_s10, 4096  ;;  %s2708_s22 = smov [#allocation10]  }
 0x33b   : > { %p2620_p11 = scmp.ne.s32.totalorder %s3508_s10, %s2619_s0  ;;  %s2623_s25 = sshll.u32 %s2708_s22, 4  ;;  %s2624_s25 = int_to_ptr.vmem [resolvable:$false] %s2623_s25 }
 0x33c   : > { %s2625_s15 = scalar_lea.vmem %s2624_s25, 8192  ;;  %p2626_p5 = scmp.lt.s32.totalorder %s3508_s10, %s2624_s25 }
 0x33d   : > { %p2621_p4 = pnand %p2620_p11, %p3587_p0  ;;  %p2627_p1 = scmp.lt.s32.totalorder %s2625_s15, %s2619_s0 }
 0x33f   : > { %p2622_p3 = pneg %p2621_p4  ;;  %p2628_p7 = por %p2627_p1, %p2626_p5 }
 0x341   : > { %p2629_p9 = pnand %p2628_p7, %p2622_p3 }
 0x3c2   : > { %v2067_v36 = vpop.f32.mrb[16].mxu0 }
 0x3c3   : > { %1506 = vst [vmem:[%s3468_s12 + $0x8] sm:$0xff] %v2067_v36  ;;  %v1281_v29 = vpop.f32.mrb[17].mxu0 }
 0x3c4   : > { %1505 = vst [vmem:[%s3468_s12] sm:$0xff] %v1281_v29 }
 0x3c5   : > { %v2123_v61 = vpop.f32.mrb[16].mxu1 }
 0x3c6   : > { %1522 = vst [vmem:[%s3468_s12 + $0x88] sm:$0xff] %v2123_v61  ;;  %v1426_v23 = vpop.f32.mrb[17].mxu1 }
 0x3c7   : > { %1521 = vst [vmem:[%s3468_s12 + $0x80] sm:$0xff] %v1426_v23 }
 0x3ca   : > { %v2070_v20 = vpop.f32.mrb[18].mxu0 }
 0x3cb   : > { %1508 = vst [vmem:[%s3468_s12 + $0x18] sm:$0xff] %v2070_v20  ;;  %v1291_v21 = vpop.f32.mrb[19].mxu0 }
 0x3cc   : > { %1507 = vst [vmem:[%s3468_s12 + $0x10] sm:$0xff] %v1291_v21 }
 0x3cd   : > { %v2126_v38 = vpop.f32.mrb[18].mxu1 }
 0x3ce   : > { %1524 = vst [vmem:[%s3468_s12 + $0x98] sm:$0xff] %v2126_v38  ;;  %v1436_v28 = vpop.f32.mrb[19].mxu1 }
 0x3cf   : > { %1523 = vst [vmem:[%s3468_s12 + $0x90] sm:$0xff] %v1436_v28 }
 0x3d2   : > { %v2073_v26 = vpop.f32.mrb[20].mxu0 }
 0x3d3   : > { %1510 = vst [vmem:[%s3468_s12 + $0x28] sm:$0xff] %v2073_v26  ;;  %v1301_v39 = vpop.f32.mrb[21].mxu0 }
 0x3d4   : > { %1509 = vst [vmem:[%s3468_s12 + $0x20] sm:$0xff] %v1301_v39 }
 0x3d5   : > { %v2129_v32 = vpop.f32.mrb[20].mxu1 }
 0x3d6   : > { %1526 = vst [vmem:[%s3468_s12 + $0xa8] sm:$0xff] %v2129_v32  ;;  %v1446_v30 = vpop.f32.mrb[21].mxu1 }
 0x3d7   : > { %1525 = vst [vmem:[%s3468_s12 + $0xa0] sm:$0xff] %v1446_v30 }
 0x3da   : > { %v2076_v47 = vpop.f32.mrb[22].mxu0 }
 0x3db   : > { %1512 = vst [vmem:[%s3468_s12 + $0x38] sm:$0xff] %v2076_v47  ;;  %v1311_v48 = vpop.f32.mrb[23].mxu0 }
 0x3dc   : > { %1511 = vst [vmem:[%s3468_s12 + $0x30] sm:$0xff] %v1311_v48 }
 0x3dd   : > { %v2132_v37 = vpop.f32.mrb[22].mxu1 }
 0x3de   : > { %1528 = vst [vmem:[%s3468_s12 + $0xb8] sm:$0xff] %v2132_v37  ;;  %v1456_v40 = vpop.f32.mrb[23].mxu1 }
 0x3df   : > { %1527 = vst [vmem:[%s3468_s12 + $0xb0] sm:$0xff] %v1456_v40 }
 0x3e2   : > { %v2079_v42 = vpop.f32.mrb[24].mxu0 }
 0x3e3   : > { %1514 = vst [vmem:[%s3468_s12 + $0x48] sm:$0xff] %v2079_v42  ;;  %v1321_v35 = vpop.f32.mrb[25].mxu0 }
 0x3e4   : > { %1513 = vst [vmem:[%s3468_s12 + $0x40] sm:$0xff] %v1321_v35 }
 0x3e5   : > { %v2135_v4 = vpop.f32.mrb[24].mxu1 }
 0x3e6   : > { %1530 = vst [vmem:[%s3468_s12 + $0xc8] sm:$0xff] %v2135_v4  ;;  %v1466_v7 = vpop.f32.mrb[25].mxu1 }
 0x3e7   : > { %1529 = vst [vmem:[%s3468_s12 + $0xc0] sm:$0xff] %v1466_v7 }
 0x3ea   : > { %v2082_v49 = vpop.f32.mrb[26].mxu0 }
 0x3eb   : > { %1516 = vst [vmem:[%s3468_s12 + $0x58] sm:$0xff] %v2082_v49  ;;  %v1331_v2 = vpop.f32.mrb[27].mxu0 }
 0x3ec   : > { %1515 = vst [vmem:[%s3468_s12 + $0x50] sm:$0xff] %v1331_v2 }
 0x3ed   : > { %v2138_v44 = vpop.f32.mrb[26].mxu1 }
 0x3ee   : > { %1532 = vst [vmem:[%s3468_s12 + $0xd8] sm:$0xff] %v2138_v44  ;;  %v1476_v43 = vpop.f32.mrb[27].mxu1 }
 0x3ef   : > { %1531 = vst [vmem:[%s3468_s12 + $0xd0] sm:$0xff] %v1476_v43 }
 0x3f2   : > { %v2085_v22 = vpop.f32.mrb[28].mxu0 }
 0x3f3   : > { %1518 = vst [vmem:[%s3468_s12 + $0x68] sm:$0xff] %v2085_v22  ;;  %v1341_v27 = vpop.f32.mrb[29].mxu0 }
 0x3f4   : > { %1517 = vst [vmem:[%s3468_s12 + $0x60] sm:$0xff] %v1341_v27 }
 0x3f5   : > { %v2141_v3 = vpop.f32.mrb[28].mxu1 }
 0x3f6   : > { %1534 = vst [vmem:[%s3468_s12 + $0xe8] sm:$0xff] %v2141_v3  ;;  %v1486_v46 = vpop.f32.mrb[29].mxu1 }
 0x3f7   : > { %1533 = vst [vmem:[%s3468_s12 + $0xe0] sm:$0xff] %v1486_v46 }
 0x3f9   : > { %v2088_v56 = vpop.f32.mrb[30].mxu0 }
 0x3fa   : > { %1520 = vst [vmem:[%s3468_s12 + $0x78] sm:$0xff] %v2088_v56  ;;  %v1351_v45 = vpop.f32.mrb[31].mxu0 }
 0x3fb   : > { %1519 = vst [vmem:[%s3468_s12 + $0x70] sm:$0xff] %v1351_v45 }
 0x3fc   : > { %v2144_v41 = vpop.f32.mrb[30].mxu1 }
 0x3fd   : > { %1536 = vst [vmem:[%s3468_s12 + $0xf8] sm:$0xff] %v2144_v41  ;;  %v1496_v34 = vpop.f32.mrb[31].mxu1 }
 0x3fe   : > { %1535 = vst [vmem:[%s3468_s12 + $0xf0] sm:$0xff] %v1496_v34 }
 0x3ff   : > { %2632 = shalt.err (!%p2629_p9)
}
 0x400   : > { %s2633_s20 = scalar_lea.hbm %s3506_s1, 4096  ;;  %s2637_s6 = scalar_lea.hbm %s3561_s4, 8192 }
 0x401   : > { %p2634_p12 = scmp.ne.s32.totalorder %s3506_s1, %s2633_s20  ;;  %p2638_p13 = scmp.lt.u32.totalorder %s3506_s1, %s3561_s4 }
 0x402   : > { %p2639_p8 = scmp.lt.u32.totalorder %s2637_s6, %s2633_s20  ;;  %p2641_p11 = scmp.lt.u32.totalorder %s2633_s20, %s3506_s1 }
 0x403   : > { %p2635_p2 = pnand %p2634_p12, %p3587_p0 }
 0x404   : > { %p2640_p10 = por %p2639_p8, %p2638_p13 }
 0x405   : > { %p2636_p6 = pneg %p2635_p2 }
 0x406   : > { %p2642_p4 = por %p2641_p11, %p2640_p10 }
 0x408   : > { %p2643_p3 = pnand %p2642_p4, %p2636_p6 }
 0x40a   : > { %2646 = shalt.err (!%p2643_p3)
}
 0x40b   : > { %2281 = dma.vmem_to_hbm [thread:$0]  (%p3587_p0), %s3508_s10, 4096, %s3506_s1, %s1538_s8, %s2706_s14, %s2706_s14, %s2707_s28  }
 0x40c PF: > { %s1589_s11 = sand.u32 1, %s2685_s18   ;;  %p3588_p5 = scmp.ne.s32.totalorder %s3576_s30, 0 }
 0x40d   : > { %p3589_p1 = scmp.ge.s32.totalorder %s2697_s21, 2  ;;  %s1590_s13 = scalar_lea.sflag [#allocation4], %s1589_s11 }
 0x40f   : > { %p2299_p7 = pnand %p3589_p1, %p3588_p5 }
 0x411   : > { %2676 = dma.done.wait (!%p2299_p7), %s1590_s13, 4096  }
 0x412   : > { %2678 = vsyncadd (!%p2299_p7), %s1590_s13, 4294963200  ;;  %s1599_s29 = scalar_lea.sflag [#allocation12], %s1589_s11 }
 0x413   : > { %2680 = dma.done.wait (!%p2299_p7), %s1599_s29, 4096  }
 0x414   : > { %2682 = vsyncadd (!%p2299_p7), %s1599_s29, 4294963200  ;;  %s3590_s23 = sld [smem:[#allocation18_spill]]  ;;  %s3591_s20 = sld [smem:[#allocation19_spill]] }
 0x415   : > { %p28_p0 = scmp.ge.s32.totalorder %s2764_s24, 4   ;;  %s3592_s18 = smov %s2689_s19 }
 0x416   : > { %s3594_s21 = smov %s2764_s24 }
 0x417   :  { %30 = sbr.rel (!%p28_p0) target bundleno = 14 (0xe), region = 135 }
 0x41a   : > { %s3593_s19 = smov %s3590_s23 }
 0x41e   :  { %1604 = vsyncpa [#allocation3], 1 }
 0x41f   :  { %1606 = vsyncpa [#allocation3 + $0x1], 1 }
 0x420   :  { %1607 = vsyncpa [#allocation6], 1 }
 0x421   :  { %1609 = vsyncpa [#allocation6 + $0x1], 1 }
 0x422   :  { %1610 = vsyncpa [#allocation9], 1 }
 0x423   :  { %1612 = vsyncpa [#allocation9 + $0x1], 1 }
 0x424   :  { %1613 = vsyncpa [#allocation4], 1 }
 0x425   :  { %1615 = vsyncpa [#allocation4 + $0x1], 1 }
 0x426   :  { %1616 = vsyncpa [#allocation12], 1 }
 0x427   :  { %1618 = vsyncpa [#allocation12 + $0x1], 1 }

</bundles_post_ra>
